<compile_context>
chip_gen: v5e
topology: v5e:2x2
jax: 0.10.0
libtpu: 0.0.40
codegen_flags: <defaults>
</compile_context>

<pallas_src>
import functools

import jax
import jax.numpy as jnp
from jax import lax
from jax.experimental import pallas as pl
from jax.experimental.pallas import tpu as pltpu


# ---------------------------------------------------------------------------
# Shared kernel body: frames -> finalscore for one block of `tb` batches.
# ---------------------------------------------------------------------------
def _finalscore(sap_ref, x_ref, npT_ref, scores_scr, *, tb, T, stride, n_windows):
    """Returns finalscore (tb, P) float32 for the tb batches of this grid step."""
    # x_ref block: (tb*T, N) time-major frames (N on lanes).
    xf = x_ref[...]
    # per-frame L2 normalization over N (reference: frames / sqrt(sum + 1e-9))
    inv_fn = lax.rsqrt(jnp.sum(xf * xf, axis=1, keepdims=True) + 1e-9)       # (tb*T, 1)
    xn = (xf * inv_fn).astype(npT_ref.dtype)

    # ONE batched MXU matmul for all tb batches: (tb*T, N) @ (N, P), contract N.
    scores = jnp.dot(xn, npT_ref[...], preferred_element_type=jnp.float32)   # (tb*T, P)

    # Single dense store, then pool with sublane-strided loads (no per-batch
    # store/reload dependency chain across the batch loop).
    scores_scr[...] = scores
    if T % stride == 0:
        # Windows tile contiguously across batch boundaries -> one strided load per k.
        tot = tb * n_windows
        pooled = scores_scr[pl.ds(0, tot, stride=stride), :]
        for k in range(1, stride):
            pooled = jnp.maximum(pooled, scores_scr[pl.ds(k, tot, stride=stride), :])
    else:
        # Leftover frames at each batch tail: pool each batch separately (still only
        # `stride` loads per batch; matches MaxPool1d's dropped tail).
        parts = []
        for b in range(tb):
            pb = scores_scr[pl.ds(b * T, n_windows, stride=stride), :]
            for k in range(1, stride):
                pb = jnp.maximum(pb, scores_scr[pl.ds(b * T + k, n_windows, stride=stride), :])
            parts.append(pb)
        pooled = jnp.concatenate(parts, axis=0)                              # (tb*n_w, P)

    # Per-batch window sum (free view when n_windows % 8 == 0, e.g. 8 here, 48 for HCP).
    fs_sum = pooled.reshape(tb, n_windows, pooled.shape[-1]).sum(axis=1)     # (tb, P)

    # finalscore = window_sum / size_after_pool  (scalar per batch from SMEM prefetch;
    # sap == 0 -> inf, matching the reference hazard when length < stride).
    base = pl.program_id(0) * tb
    bidx = lax.broadcasted_iota(jnp.int32, (tb, 1), 0)
    sap = jnp.ones((tb, 1), jnp.float32)
    for i in range(tb):
        sap = jnp.where(bidx == i, sap_ref[base + i].astype(jnp.float32), sap)
    return fs_sum / sap                                                      # (tb, P) f32


# ---------------------------------------------------------------------------
# Small-N kernel: lane-dense (tb, N*N) graphs slab via a single matmul against
# Wm[p, n*N+m] = toppattern[p,n]*toppattern[p,m]/(maskgraph[n,m]+1e-9).
# ---------------------------------------------------------------------------
def _tfbnc_kernel_flat(sap_ref, x_ref, npT_ref, wm_ref, out_ref, scores_scr,
                       *, tb, T, stride, n_windows):
    fs = _finalscore(sap_ref, x_ref, npT_ref, scores_scr,
                     tb=tb, T=T, stride=stride, n_windows=n_windows)
    out_ref[...] = jnp.dot(fs.astype(wm_ref.dtype), wm_ref[...],
                           preferred_element_type=jnp.float32).astype(out_ref.dtype)


# ---------------------------------------------------------------------------
# Large-N kernel: (tb*N, P) @ (P, N) outer-product form, (b_pad*N, N) output
# (the P x N*N weight of the flat form would not fit VMEM at N~200).
# ---------------------------------------------------------------------------
def _tfbnc_kernel_wide(sap_ref, x_ref, npT_ref, tpT_ref, inv_mg_ref, out_ref, scores_scr,
                       *, tb, N, P, T, stride, n_windows):
    fs = _finalscore(sap_ref, x_ref, npT_ref, scores_scr,
                     tb=tb, T=T, stride=stride, n_windows=n_windows)
    tpT = tpT_ref[...]                                                       # (N, P)
    u = fs[:, None, :] * tpT.astype(jnp.float32)[None, :, :]                 # (tb, N, P)
    u = u.reshape(tb * N, P).astype(tpT.dtype)                               # free (N%8==0)
    g = lax.dot_general(u, tpT, (((1,), (1,)), ((), ())),
                        preferred_element_type=jnp.float32)                  # (tb*N, N)
    out_ref[...] = (g * inv_mg_ref[...]).astype(out_ref.dtype)


# ---------------------------------------------------------------------------
# TFBNC.forward (HCP_static path)
# ---------------------------------------------------------------------------
def tfbnc_forward(x, length, patterns, *, stride, topK, tb=8,
                  mxu_dtype=jnp.bfloat16, vmem_limit_bytes=None):
    x = jnp.asarray(x, jnp.float32)
    length = jnp.asarray(length, jnp.float32)
    patterns = jnp.asarray(patterns, jnp.float32)

    B, N, T = x.shape
    P = patterns.shape[0]
    n_windows = T // stride
    assert n_windows >= 1, "time dimension must contain at least one pooling window"
    assert topK >= 1 and B >= 1

    # ---------------- pattern prep in XLA (parameter-only; hoisted per review) ----------
    npat = patterns / jnp.sqrt((patterns ** 2).sum(-1, keepdims=True) + 1e-9)   # (P, N)
    _, idx = lax.top_k(jnp.abs(npat), topK)                                     # exact top-K
    mask = jnp.zeros_like(npat).at[jnp.arange(P)[:, None], idx].set(1.0)
    toppattern = mask * npat
    maskgraph = mask.T @ mask                                                   # (N, N)
    inv_mg = 1.0 / (maskgraph + 1e-9)
    lenp = jnp.linalg.norm(npat, axis=-1)
    lentopp = jnp.linalg.norm(toppattern, axis=-1)
    norm = ((1.0 - lentopp / lenp) ** 2).sum() / 800.0                          # Critical_ROI

    # Flat (lane-dense) graphs form is used when its P x N*N weight is small enough to
    # sit in VMEM; otherwise fall back to the outer-product form.
    wm_bytes = P * N * N * jnp.dtype(mxu_dtype).itemsize
    use_flat = (wm_bytes <= (2 << 20)) or (N % 8 != 0)

    # ---------------- batch blocking ----------------
    tb = max(1, min(tb, B))
    b_pad = -(-B // tb) * tb
    if use_flat and (b_pad // tb) > 1 and tb % 8 != 0:
        # (8,128) rule: the (tb, N*N) output block needs a sublane-aligned tb when it
        # does not cover the whole batch axis.
        tb = ((tb + 7) // 8) * 8
        b_pad = -(-B // tb) * tb
    grid = (b_pad // tb,)

    sap = jnp.floor(length / stride).astype(jnp.int32)                          # (B,)
    if b_pad != B:
        x = jnp.pad(x, ((0, b_pad - B), (0, 0), (0, 0)))
        sap = jnp.pad(sap, (0, b_pad - B), constant_values=1)   # padded rows sliced off later

    # Time-major frames, flattened so each grid step reads one dense (tb*T, N) slab and
    # every in-kernel reshape is a free major-dim collapse (one streaming XLA copy of x).
    x_frames = jnp.transpose(x, (0, 2, 1)).reshape(b_pad * T, N)

    npT = npat.T.astype(mxu_dtype)                                               # (N, P)

    cp_kwargs = dict(dimension_semantics=("parallel",))
    if vmem_limit_bytes is not None:
        cp_kwargs["vmem_limit_bytes"] = vmem_limit_bytes
    cp = pltpu.CompilerParams(**cp_kwargs)

    if use_flat:
        wm = (toppattern[:, :, None] * toppattern[:, None, :] * inv_mg[None]
              ).reshape(P, N * N).astype(mxu_dtype)                              # (P, N*N)
        kernel = functools.partial(_tfbnc_kernel_flat, tb=tb, T=T,
                                   stride=stride, n_windows=n_windows)
        grid_spec = pltpu.PrefetchScalarGridSpec(
            num_scalar_prefetch=1,                       # size_after_pool -> SMEM
            grid=grid,
            in_specs=[
                pl.BlockSpec((tb * T, N), lambda b, sap_r: (b, 0)),
                pl.BlockSpec((N, P), lambda b, sap_r: (0, 0)),
                pl.BlockSpec((P, N * N), lambda b, sap_r: (0, 0)),
            ],
            out_specs=pl.BlockSpec((tb, N * N), lambda b, sap_r: (b, 0)),
            scratch_shapes=[pltpu.VMEM((tb * T, P), jnp.float32)],
        )
        out_flat = pl.pallas_call(
            kernel,
            out_shape=jax.ShapeDtypeStruct((b_pad, N * N), jnp.float32),
            grid_spec=grid_spec,
            compiler_params=cp,
        )(sap, x_frames, npT, wm)
        graphs = out_flat.reshape(b_pad, N, N)[:B]
    else:
        tpT = toppattern.T.astype(mxu_dtype)                                     # (N, P)
        inv_mg_t = jnp.tile(inv_mg, (tb, 1)).astype(jnp.float32)                 # (tb*N, N)
        kernel = functools.partial(_tfbnc_kernel_wide, tb=tb, N=N, P=P, T=T,
                                   stride=stride, n_windows=n_windows)
        grid_spec = pltpu.PrefetchScalarGridSpec(
            num_scalar_prefetch=1,
            grid=grid,
            in_specs=[
                pl.BlockSpec((tb * T, N), lambda b, sap_r: (b, 0)),
                pl.BlockSpec((N, P), lambda b, sap_r: (0, 0)),
                pl.BlockSpec((N, P), lambda b, sap_r: (0, 0)),
                pl.BlockSpec((tb * N, N), lambda b, sap_r: (0, 0)),
            ],
            out_specs=pl.BlockSpec((tb * N, N), lambda b, sap_r: (b, 0)),
            scratch_shapes=[pltpu.VMEM((tb * T, P), jnp.float32)],
        )
        out_wide = pl.pallas_call(
            kernel,
            out_shape=jax.ShapeDtypeStruct((b_pad * N, N), jnp.float32),
            grid_spec=grid_spec,
            compiler_params=cp,
        )(sap, x_frames, npT, tpT, inv_mg_t)
        graphs = out_wide.reshape(b_pad, N, N)[:B]

    # TODO(synk): MRI_length_regularize (non-HCP_static branch) needs data-dependent
    #             nonzero()/gather with dynamic output shapes - no clean Pallas equivalent.
    # TODO(synk): Graph_Analysis requires the external Baselines.* submodels (classifier
    #             'ae' also matches no branch in the reference) - graphs passed through.
    out = graphs
    rec = jnp.zeros((1,), jnp.int32)                                             # torch.tensor([0])
    return out, norm, rec


# ---------------------------------------------------------------------------
# Pure-JAX reference (for correctness check)
# ---------------------------------------------------------------------------
def reference_forward(x, length, patterns, stride, topK):
    hp = lax.Precision.HIGHEST
    frames = jnp.transpose(x, (0, 2, 1))
    sap = jnp.floor(length / stride)[:, None, None]
    nf = frames / jnp.sqrt((frames ** 2).sum(-1, keepdims=True) + 1e-9)
    npat = patterns / jnp.sqrt((patterns ** 2).sum(-1, keepdims=True) + 1e-9)
    _, idx = lax.top_k(jnp.abs(npat), topK)
    mask = jnp.zeros_like(npat).at[jnp.arange(npat.shape[0])[:, None], idx].set(1.0)
    toppattern = mask * npat
    scores = jnp.einsum('abc,dc->abd', nf, npat, precision=hp)
    B, T, P = scores.shape
    posscores = scores.transpose(0, 2, 1).reshape(B, P, T // stride, stride).max(-1)
    finalscore = (posscores / sap).sum(-1)
    maskgraph = mask.T @ mask
    graphs = jnp.einsum('pn,bp,pm->bnm', toppattern, finalscore, toppattern,
                        precision=hp) / (maskgraph + 1e-9)
    lenp = jnp.linalg.norm(npat, axis=-1)
    lentopp = jnp.linalg.norm(toppattern, axis=-1)
    norm = ((1.0 - lentopp / lenp) ** 2).sum() / 800.0
    return graphs, norm


if __name__ == "__main__":
    B, N, P, T = 13, 16, 32, 40          # batch, num_of_node, num_of_pattern, time
    stride, topK = 5, 3

    key = jax.random.PRNGKey(0)
    k1, k2 = jax.random.split(key)

    # nn.init.xavier_uniform_(patterns, gain=1.414): fan_in=N, fan_out=P
    bound = 1.414 * (6.0 / (N + P)) ** 0.5
    patterns = jax.random.uniform(k1, (P, N), jnp.float32, -bound, bound)

    x = jax.random.normal(k2, (B, N, T), jnp.float32)                        # (B, N, T)
    length = 25.0 + 5.0 * (jnp.arange(B, dtype=jnp.float32) % 4)             # in [25, 40]

    ref_graphs, ref_norm = reference_forward(x, length, patterns, stride, topK)

    # f32 MXU path (strict check); tb=8, B=13 -> b_pad=16, grid=(2,) (multi-step,
    # exercises batch padding, v7x-friendly even step count).
    out, norm, rec = tfbnc_forward(x, length, patterns, stride=stride, topK=topK,
                                   tb=8, mxu_dtype=jnp.float32)
    jax.block_until_ready((out, norm, rec))
    assert out.shape == (B, N, N)
    assert jnp.allclose(out, ref_graphs, rtol=1e-3, atol=1e-3), "graphs mismatch (f32)"
    assert jnp.allclose(norm, ref_norm, rtol=1e-3, atol=1e-5), "Critical_ROI norm mismatch"

    # Default path: bf16 MXU operands, f32 accumulation (recommended on v6e/v7x).
    out_bf, norm_bf, _ = tfbnc_forward(x, length, patterns, stride=stride, topK=topK, tb=8)
    jax.block_until_ready((out_bf, norm_bf))
    assert jnp.allclose(out_bf, ref_graphs, rtol=5e-2, atol=5e-2), "graphs mismatch (bf16)"

    print("KERNEL_OK")
</pallas_src>

<mosaic_0001>
module attributes {stable_mosaic.version = 11 : i64} {
  func.func @_tfbnc_kernel_flat(%arg0: i32, %arg1: memref<16xi32, #tpu.memory_space<smem>>, %arg2: memref<320x16xf32, #tpu.memory_space<vmem>>, %arg3: memref<16x32xf32, #tpu.memory_space<vmem>>, %arg4: memref<32x256xf32, #tpu.memory_space<vmem>>, %arg5: memref<8x256xf32, #tpu.memory_space<vmem>>, %arg6: memref<320x32xf32, #tpu.memory_space<vmem>>) attributes {dimension_semantics = [#tpu.dimension_semantics<parallel>], iteration_bounds = array<i64: 2>, scalar_prefetch = 1 : i64, scratch_operands = 1 : i64, tpu.core_type = #tpu.core_type<tc>, window_params = [{transform_indices = @transform_0, window_bounds = array<i64: 320, 16>}, {pipeline_mode = #tpu.pipeline_mode<synchronous>, transform_indices = @transform_1, window_bounds = array<i64: 16, 32>}, {pipeline_mode = #tpu.pipeline_mode<synchronous>, transform_indices = @transform_2, window_bounds = array<i64: 32, 256>}, {transform_indices = @transform_3, window_bounds = array<i64: 8, 256>}]} {
    %c0 = arith.constant 0 : index
    %c0_0 = arith.constant 0 : index
    %0 = vector.load %arg2[%c0, %c0_0] : memref<320x16xf32, #tpu.memory_space<vmem>>, vector<320x16xf32>
    %1 = arith.mulf %0, %0 : vector<320x16xf32>
    %cst = arith.constant dense<0.000000e+00> : vector<320xf32>
    %2 = vector.multi_reduction <add>, %1, %cst [1] : vector<320x16xf32> to vector<320xf32>
    %3 = vector.shape_cast %2 : vector<320xf32> to vector<320x1xf32>
    %cst_1 = arith.constant 9.99999971E-10 : f32
    %4 = vector.broadcast %cst_1 : f32 to vector<320x1xf32>
    %5 = arith.addf %3, %4 : vector<320x1xf32>
    %6 = math.rsqrt %5 : vector<320x1xf32>
    %7 = vector.broadcast %6 : vector<320x1xf32> to vector<320x16xf32>
    %8 = arith.mulf %0, %7 : vector<320x16xf32>
    %c0_2 = arith.constant 0 : index
    %c0_3 = arith.constant 0 : index
    %9 = vector.load %arg3[%c0_2, %c0_3] : memref<16x32xf32, #tpu.memory_space<vmem>>, vector<16x32xf32>
    %cst_4 = arith.constant dense<0.000000e+00> : vector<320x32xf32>
    %10 = tpu.matmul %8, %9, %cst_4 {dimension_numbers = #tpu.dot_dimension_numbers<[1], [0], [0], [1], [0, 0, 1, 1], [], []>} : vector<320x16xf32>, vector<16x32xf32>, vector<320x32xf32> -> vector<320x32xf32>
    %c0_5 = arith.constant 0 : index
    %c0_6 = arith.constant 0 : index
    %11 = vector.load %arg6[%c0_5, %c0_6] : memref<320x32xf32, #tpu.memory_space<vmem>>, vector<320x32xf32>
    tpu.vector_store %arg6[%c0_5, %c0_6], %10 {strides = array<i32>} : memref<320x32xf32, #tpu.memory_space<vmem>>, vector<320x32xf32>,
    %c0_7 = arith.constant 0 : index
    %c0_8 = arith.constant 0 : index
    %12 = tpu.strided_load %arg6[%c0_7, %c0_8] {strides = array<i32: 5, 1>} : memref<320x32xf32, #tpu.memory_space<vmem>>, vector<64x32xf32>
    %c1 = arith.constant 1 : index
    %c0_9 = arith.constant 0 : index
    %13 = tpu.strided_load %arg6[%c1, %c0_9] {strides = array<i32: 5, 1>} : memref<320x32xf32, #tpu.memory_space<vmem>>, vector<64x32xf32>
    %14 = arith.maximumf %12, %13 : vector<64x32xf32>
    %c2 = arith.constant 2 : index
    %c0_10 = arith.constant 0 : index
    %15 = tpu.strided_load %arg6[%c2, %c0_10] {strides = array<i32: 5, 1>} : memref<320x32xf32, #tpu.memory_space<vmem>>, vector<64x32xf32>
    %16 = arith.maximumf %14, %15 : vector<64x32xf32>
    %c3 = arith.constant 3 : index
    %c0_11 = arith.constant 0 : index
    %17 = tpu.strided_load %arg6[%c3, %c0_11] {strides = array<i32: 5, 1>} : memref<320x32xf32, #tpu.memory_space<vmem>>, vector<64x32xf32>
    %18 = arith.maximumf %16, %17 : vector<64x32xf32>
    %c4 = arith.constant 4 : index
    %c0_12 = arith.constant 0 : index
    %19 = tpu.strided_load %arg6[%c4, %c0_12] {strides = array<i32: 5, 1>} : memref<320x32xf32, #tpu.memory_space<vmem>>, vector<64x32xf32>
    %20 = arith.maximumf %18, %19 : vector<64x32xf32>
    %21 = vector.shape_cast %20 : vector<64x32xf32> to vector<8x8x32xf32>
    %cst_13 = arith.constant dense<0.000000e+00> : vector<8x32xf32>
    %22 = vector.multi_reduction <add>, %21, %cst_13 [1] : vector<8x8x32xf32> to vector<8x32xf32>
    %c8_i32 = arith.constant 8 : i32
    %23 = arith.muli %arg0, %c8_i32 : i32
    %24 = tpu.iota {dimensions = array<i32: 0>} : vector<8x1xi32>
    %cst_14 = arith.constant 1.000000e+00 : f32
    %25 = vector.broadcast %cst_14 : f32 to vector<8x1xf32>
    %c0_i32 = arith.constant 0 : i32
    %26 = vector.broadcast %c0_i32 : i32 to vector<8x1xi32>
    %27 = arith.cmpi eq, %24, %26 : vector<8x1xi32>
    %c0_i32_15 = arith.constant 0 : i32
    %28 = arith.addi %23, %c0_i32_15 : i32
    %29 = arith.index_cast %28 : i32 to index
    %30 = memref.load %arg1[%29] : memref<16xi32, #tpu.memory_space<smem>>
    %31 = arith.sitofp %30 : i32 to f32
    %32 = vector.broadcast %31 : f32 to vector<8x1xf32>
    %33 = arith.select %27, %32, %25 : vector<8x1xi1>, vector<8x1xf32>
    %c1_i32 = arith.constant 1 : i32
    %34 = vector.broadcast %c1_i32 : i32 to vector<8x1xi32>
    %35 = arith.cmpi eq, %24, %34 : vector<8x1xi32>
    %c1_i32_16 = arith.constant 1 : i32
    %36 = arith.addi %23, %c1_i32_16 : i32
    %37 = arith.index_cast %36 : i32 to index
    %38 = memref.load %arg1[%37] : memref<16xi32, #tpu.memory_space<smem>>
    %39 = arith.sitofp %38 : i32 to f32
    %40 = vector.broadcast %39 : f32 to vector<8x1xf32>
    %41 = arith.select %35, %40, %33 : vector<8x1xi1>, vector<8x1xf32>
    %c2_i32 = arith.constant 2 : i32
    %42 = vector.broadcast %c2_i32 : i32 to vector<8x1xi32>
    %43 = arith.cmpi eq, %24, %42 : vector<8x1xi32>
    %c2_i32_17 = arith.constant 2 : i32
    %44 = arith.addi %23, %c2_i32_17 : i32
    %45 = arith.index_cast %44 : i32 to index
    %46 = memref.load %arg1[%45] : memref<16xi32, #tpu.memory_space<smem>>
    %47 = arith.sitofp %46 : i32 to f32
    %48 = vector.broadcast %47 : f32 to vector<8x1xf32>
    %49 = arith.select %43, %48, %41 : vector<8x1xi1>, vector<8x1xf32>
    %c3_i32 = arith.constant 3 : i32
    %50 = vector.broadcast %c3_i32 : i32 to vector<8x1xi32>
    %51 = arith.cmpi eq, %24, %50 : vector<8x1xi32>
    %c3_i32_18 = arith.constant 3 : i32
    %52 = arith.addi %23, %c3_i32_18 : i32
    %53 = arith.index_cast %52 : i32 to index
    %54 = memref.load %arg1[%53] : memref<16xi32, #tpu.memory_space<smem>>
    %55 = arith.sitofp %54 : i32 to f32
    %56 = vector.broadcast %55 : f32 to vector<8x1xf32>
    %57 = arith.select %51, %56, %49 : vector<8x1xi1>, vector<8x1xf32>
    %c4_i32 = arith.constant 4 : i32
    %58 = vector.broadcast %c4_i32 : i32 to vector<8x1xi32>
    %59 = arith.cmpi eq, %24, %58 : vector<8x1xi32>
    %c4_i32_19 = arith.constant 4 : i32
    %60 = arith.addi %23, %c4_i32_19 : i32
    %61 = arith.index_cast %60 : i32 to index
    %62 = memref.load %arg1[%61] : memref<16xi32, #tpu.memory_space<smem>>
    %63 = arith.sitofp %62 : i32 to f32
    %64 = vector.broadcast %63 : f32 to vector<8x1xf32>
    %65 = arith.select %59, %64, %57 : vector<8x1xi1>, vector<8x1xf32>
    %c5_i32 = arith.constant 5 : i32
    %66 = vector.broadcast %c5_i32 : i32 to vector<8x1xi32>
    %67 = arith.cmpi eq, %24, %66 : vector<8x1xi32>
    %c5_i32_20 = arith.constant 5 : i32
    %68 = arith.addi %23, %c5_i32_20 : i32
    %69 = arith.index_cast %68 : i32 to index
    %70 = memref.load %arg1[%69] : memref<16xi32, #tpu.memory_space<smem>>
    %71 = arith.sitofp %70 : i32 to f32
    %72 = vector.broadcast %71 : f32 to vector<8x1xf32>
    %73 = arith.select %67, %72, %65 : vector<8x1xi1>, vector<8x1xf32>
    %c6_i32 = arith.constant 6 : i32
    %74 = vector.broadcast %c6_i32 : i32 to vector<8x1xi32>
    %75 = arith.cmpi eq, %24, %74 : vector<8x1xi32>
    %c6_i32_21 = arith.constant 6 : i32
    %76 = arith.addi %23, %c6_i32_21 : i32
    %77 = arith.index_cast %76 : i32 to index
    %78 = memref.load %arg1[%77] : memref<16xi32, #tpu.memory_space<smem>>
    %79 = arith.sitofp %78 : i32 to f32
    %80 = vector.broadcast %79 : f32 to vector<8x1xf32>
    %81 = arith.select %75, %80, %73 : vector<8x1xi1>, vector<8x1xf32>
    %c7_i32 = arith.constant 7 : i32
    %82 = vector.broadcast %c7_i32 : i32 to vector<8x1xi32>
    %83 = arith.cmpi eq, %24, %82 : vector<8x1xi32>
    %c7_i32_22 = arith.constant 7 : i32
    %84 = arith.addi %23, %c7_i32_22 : i32
    %85 = arith.index_cast %84 : i32 to index
    %86 = memref.load %arg1[%85] : memref<16xi32, #tpu.memory_space<smem>>
    %87 = arith.sitofp %86 : i32 to f32
    %88 = vector.broadcast %87 : f32 to vector<8x1xf32>
    %89 = arith.select %83, %88, %81 : vector<8x1xi1>, vector<8x1xf32>
    %90 = vector.broadcast %89 : vector<8x1xf32> to vector<8x32xf32>
    %91 = arith.divf %22, %90 : vector<8x32xf32>
    %c0_23 = arith.constant 0 : index
    %c0_24 = arith.constant 0 : index
    %92 = vector.load %arg4[%c0_23, %c0_24] : memref<32x256xf32, #tpu.memory_space<vmem>>, vector<32x256xf32>
    %cst_25 = arith.constant dense<0.000000e+00> : vector<8x256xf32>
    %93 = tpu.matmul %91, %92, %cst_25 {dimension_numbers = #tpu.dot_dimension_numbers<[1], [0], [0], [1], [0, 0, 1, 1], [], []>} : vector<8x32xf32>, vector<32x256xf32>, vector<8x256xf32> -> vector<8x256xf32>
    %c0_26 = arith.constant 0 : index
    %c0_27 = arith.constant 0 : index
    %94 = vector.load %arg5[%c0_26, %c0_27] : memref<8x256xf32, #tpu.memory_space<vmem>>, vector<8x256xf32>
    tpu.vector_store %arg5[%c0_26, %c0_27], %93 {strides = array<i32>} : memref<8x256xf32, #tpu.memory_space<vmem>>, vector<8x256xf32>,
    return
  }
  func.func @transform_0(%arg0: i32, %arg1: memref<16xi32, #tpu.memory_space<smem>>) -> (i32, i32) {
    %c0_i32 = arith.constant 0 : i32
    %c0_i32_0 = arith.constant 0 : i32
    return %arg0, %c0_i32 : i32, i32
  }
  func.func @transform_1(%arg0: i32, %arg1: memref<16xi32, #tpu.memory_space<smem>>) -> (i32, i32) {
    %c0_i32 = arith.constant 0 : i32
    %c0_i32_0 = arith.constant 0 : i32
    %c0_i32_1 = arith.constant 0 : i32
    return %c0_i32, %c0_i32_0 : i32, i32
  }
  func.func @transform_2(%arg0: i32, %arg1: memref<16xi32, #tpu.memory_space<smem>>) -> (i32, i32) {
    %c0_i32 = arith.constant 0 : i32
    %c0_i32_0 = arith.constant 0 : i32
    %c0_i32_1 = arith.constant 0 : i32
    return %c0_i32, %c0_i32_0 : i32, i32
  }
  func.func @transform_3(%arg0: i32, %arg1: memref<16xi32, #tpu.memory_space<smem>>) -> (i32, i32) {
    %c0_i32 = arith.constant 0 : i32
    %c0_i32_0 = arith.constant 0 : i32
    return %arg0, %c0_i32 : i32, i32
  }
}

</mosaic_0001>

<bundles_post_ra>
// kernel: tpu_custom_call.1
= control target key start
LH: loop header
LB: loop body
LE: loop exit
PB: predicated region body
PF: predicated region fallthrough
CT: control target
= control target key end

     0   :  { %s1962_s18 = smov [#allocation4]   ;;  %s3388_s0 = inlined_call_operand.vmem [shape: s32[16], index: 0, kind: input, shape index: {}]   ;;  %s3389_s1 = inlined_call_operand.vmem [shape: f32[640,16], index: 1, kind: input, shape index: {}]   ;;  %s3390_s2 = inlined_call_operand.vmem [shape: f32[16,32], index: 2, kind: input, shape index: {}]   ;;  %s3391_s3 = inlined_call_operand.vmem [shape: f32[32,256], index: 3, kind: input, shape index: {}]   ;;  %s3392_s4 = inlined_call_operand.hbm [shape: f32[16,256], index: 4, kind: output, shape index: {}]  }
   0x1   :  { %s10_s17 = sshll.u32 %s3388_s0, 4  ;;  %s11_s17 = int_to_ptr.vmem [resolvable:$true] %s10_s17 }
   0x2   :  { %13 = dma.vmem_to_smem %s11_s17, 16, %s1962_s18, [#allocation3] }
   0x3   :  { %1940 = dma.done.wait [#allocation3], 16 }
   0x4   :  { %1941 = vsyncadd [#allocation3], 4294967280 }
   0x5   :  { %16 = sfence }
   0x6   :  { %17 = vsyncpa [#allocation6], 0 }
   0x7   :  { %19 = vsyncpa [#allocation6 + $0x1], 0  ;;  %s1991_s19 = smov 0   ;;  %s1993_s20 = smov 0  }
   0x8   :  { %s1995_s21 = smov 0   ;;  %s1997_s22 = smov 0  }
   0x9 LB: > { %s2012_s0 = sadd.s32 4294967295, %s1960_s22   ;;  %s1671_s23 = sadd.s32 4294967294, %s1960_s22   ;;  %s1960_s22 = sphi %s1997_s22, %s3464_s22   ;;  %s1956_s21 = sphi %s1995_s21, %s3463_s21   ;;  %s1952_s20 = sphi %s1993_s20, %s3462_s20   ;;  %s1948_s19 = sphi %s1991_s19, %s3461_s19  }
   0xa   : > { %s2016_s24 = sadd.s32 1, %s1960_s22   ;;  %s100_s25 = sadd.s32 1, %s1956_s21 }
   0xb   : > { %s97_s26 = ssub.s32 %s1960_s22, %s2016_s24  ;;  %p110_p0 = scmp.ne.s32.totalorder %s1956_s21, %s1952_s20 }
   0xc   : > { %p98_p1 = scmp.eq.s32.totalorder %s97_s26, 0  ;;  %p111_p2 = scmp.eq.s32.totalorder %s2012_s0, 1 }
   0xd   : > { %p116_p3 = scmp.ne.s32.totalorder %s1952_s20, %s1948_s19  ;;  %p117_p4 = scmp.eq.s32.totalorder %s1671_s23, 1 }
   0xe   : > { %s2027_s27 = scalar_select %p98_p1, %s1956_s21, %s100_s25  }
   0xf   : > { %p2029_p5 = por %p111_p2, %p110_p0  ;;  %p2033_p6 = por %p117_p4, %p116_p3 }
  0x10   : > { %p1674_p7 = scmp.ge.s32.totalorder %s1960_s22, 1  ;;  %p150_p8 = scmp.lt.s32.totalorder %s1960_s22, 3 }
  0x12   : > { %p151_p9 = pnand %p1674_p7, %p150_p8 }
  0x13   : > { %s174_s30 = smul.u32 (!%p151_p9), 40, %s2012_s0  ;;  %s2997_s13 = sshll.u32 (!%p151_p9), %s2012_s0, 3 }
  0x14   : > { %154 = sbr.rel (%p151_p9) target bundleno = 574 (0x23e), region = 32  ;;  %s1332_s14 = sld [smem:[#allocation4 + %s2997_s13]] (!%p151_p9) }
  0x15   : > { %p175_p10 = scmp.lt.s32.totalorder (!%p151_p9), %s174_s30, 79  ;;  %s1337_s15 = sadd.s32 (!%p151_p9), 1, %s2997_s13 }
  0x16   : > { %s3002_s16 = sld [smem:[#allocation4 + %s1337_s15]] (!%p151_p9)  ;;  %s1343_s17 = sadd.s32 (!%p151_p9), 2, %s2997_s13 }
  0x17   : > { %s3007_s18 = sld [smem:[#allocation4 + %s1343_s17]] (!%p151_p9)  ;;  %s1349_s23 = sadd.s32 (!%p151_p9), 3, %s2997_s13 }
  0x18   : > { %s1355_s6 = sadd.s32 (!%p151_p9), 4, %s2997_s13  ;;  %s1361_s9 = sadd.s32 (!%p151_p9), 5, %s2997_s13 }
  0x19   : > { %s3466_s30 = smov (!%p175_p10, %s174_s30), 79  ;;  %vm260_vm0 = vcmask 130048   ;;  %s3028_s11 = sld [smem:[#allocation4 + %s1361_s9]] }
  0x1a   : > { %s1676_s5 = sshll.u32 %s3466_s30, 3  ;;  %s1333_s30 = scvt.s32.f32 %s1332_s14 }
  0x1b   : > { %s2043_s8 = scalar_lea.vmem %s3389_s1, %s1676_s5  ;;  %s3015_s5 = sld [smem:[#allocation4 + %s1349_s23]] }
  0x1c   : > { %v2046_v0 = vld [vmem:[%s2043_s8 + $0xf0] sm:$0xff]  ;;  %v2049_v1 = vld [vmem:[%s2043_s8 + $0xe8] sm:$0xff]  ;;  %v2052_v2 = vld [vmem:[%s2043_s8 + $0x58] sm:$0xff]  ;;  %s1339_s7 = scvt.s32.f32 %s3002_s16  ;;  %s1367_s12 = sadd.s32 6, %s2997_s13 }
  0x1d   : > { %v250_v3 = vmul.f32 %v2046_v0, %v2046_v0  ;;  %v249_v4 = vmul.f32 %v2049_v1, %v2049_v1  ;;  %v231_v5 = vmul.f32 %v2052_v2, %v2052_v2  ;;  %v2061_v6 = vld [vmem:[%s2043_s8 + $0x8] sm:$0xff]  ;;  %v2064_v7 = vld [vmem:[%s2043_s8] sm:$0xff]  ;;  %v2070_v11 = vld [vmem:[%s2043_s8 + $0xf8] sm:$0xff]  ;;  %s1345_s10 = scvt.s32.f32 %s3007_s18  ;;  %s3034_s15 = sld [smem:[#allocation4 + %s1367_s12]] }
  0x1e   : > { %v221_v12 = vmul.f32 %v2061_v6, %v2061_v6  ;;  %v220_v13 = vmul.f32 %v2064_v7, %v2064_v7  ;;  %v251_v14 = vmul.f32 %v2070_v11, %v2070_v11  ;;  %v2082_v18 = vld [vmem:[%s2043_s8 + $0x60] sm:$0xff]  ;;  %v2085_v19 = vld [vmem:[%s2043_s8 + $0x10] sm:$0xff]  ;;  %v2088_v20 = vld [vmem:[%s2043_s8 + $0xa8] sm:$0xff]  ;;  %s1373_s16 = sadd.s32 7, %s2997_s13  ;;  %s1725_s25 = sshll.u32 %s2012_s0, 4 }
  0x1f   : > { %v351_v8 = vsel %vm260_vm0, %v250_v3, 0.0  ;;  %v348_v9 = vsel %vm260_vm0, %v249_v4, 0.0  ;;  %v294_v10 = vsel %vm260_vm0, %v231_v5, 0.0  ;;  %v232_v21 = vmul.f32 %v2082_v18, %v2082_v18  ;;  %v2100_v27 = vld [vmem:[%s2043_s8 + $0x18] sm:$0xff]  ;;  %v2103_v28 = vld [vmem:[%s2043_s8 + $0x100] sm:$0xff]  ;;  %v2106_v29 = vld [vmem:[%s2043_s8 + $0x68] sm:$0xff]  ;;  %s1363_s23 = scvt.s32.f32 %s3028_s11 }
  0x20   : > { %352 = vadd.xlane.f32.xlu1 %v351_v8  ;;  %349 = vadd.xlane.f32.xlu0 %v348_v9  ;;  %v264_v15 = vsel %vm260_vm0, %v221_v12, 0.0  ;;  %v261_v16 = vsel %vm260_vm0, %v220_v13, 0.0  ;;  %v354_v17 = vsel %vm260_vm0, %v251_v14, 0.0  ;;  %v222_v22 = vmul.f32 %v2085_v19, %v2085_v19  ;;  %v2118_v36 = vld [vmem:[%s2043_s8 + $0x108] sm:$0xff]  ;;  %v2121_v37 = vld [vmem:[%s2043_s8 + $0xb0] sm:$0xff]  ;;  %v2124_v38 = vld [vmem:[%s2043_s8 + $0x20] sm:$0xff] }
  0x21   : > { %295 = vadd.xlane.f32.xlu2 %v294_v10  ;;  %v241_v23 = vmul.f32 %v2088_v20, %v2088_v20  ;;  %v297_v24 = vsel %vm260_vm0, %v232_v21, 0.0  ;;  %v223_v30 = vmul.f32 %v2100_v27, %v2100_v27  ;;  %v252_v31 = vmul.f32 %v2103_v28, %v2103_v28  ;;  %v2136_v45 = vld [vmem:[%s2043_s8 + $0xb8] sm:$0xff]  ;;  %v2139_v46 = vld [vmem:[%s2043_s8 + $0x70] sm:$0xff]  ;;  %v2157_v55 = vld [vmem:[%s2043_s8 + $0x28] sm:$0xff]  ;;  %s1351_s14 = scvt.s32.f32 %s3015_s5  ;;  %s3039_s18 = sld [smem:[#allocation4 + %s1373_s16]] }
  0x22   : > { %v267_v25 = vsel %vm260_vm0, %v222_v22, 0.0  ;;  %v233_v32 = vmul.f32 %v2106_v29, %v2106_v29  ;;  %v253_v39 = vmul.f32 %v2118_v36, %v2118_v36  ;;  %v242_v40 = vmul.f32 %v2121_v37, %v2121_v37  ;;  %v2142_v47 = vld [vmem:[%s2043_s8 + $0x110] sm:$0xff]  ;;  %v2154_v54 = vld [vmem:[%s2043_s8 + $0x78] sm:$0xff]  ;;  %v2160_v56 = vld [vmem:[%s2043_s8 + $0xc0] sm:$0xff]  ;;  %s1916_s12 = scalar_lea.hbm %s3392_s4, 32 }
  0x23   : > { %v324_v26 = vsel %vm260_vm0, %v241_v23, 0.0  ;;  %v270_v33 = vsel %vm260_vm0, %v223_v30, 0.0  ;;  %v357_v34 = vsel %vm260_vm0, %v252_v31, 0.0  ;;  %v224_v41 = vmul.f32 %v2124_v38, %v2124_v38  ;;  %v2172_v63 = vld [vmem:[%s2043_s8 + $0x30] sm:$0xff]  ;;  %v2175_v3 = vld [vmem:[%s2043_s8 + $0x118] sm:$0xff]  ;;  %v2178_v4 = vld [vmem:[%s2043_s8 + $0x80] sm:$0xff]  ;;  %s1369_s26 = scvt.s32.f32 %s3034_s15 }
  0x24   : > { %v300_v35 = vsel %vm260_vm0, %v233_v32, 0.0  ;;  %v360_v42 = vsel %vm260_vm0, %v253_v39, 0.0  ;;  %v327_v43 = vsel %vm260_vm0, %v242_v40, 0.0  ;;  %v243_v48 = vmul.f32 %v2136_v45, %v2136_v45  ;;  %v216_v14 = vld [vmem:[%s2043_s8 + $0x120] sm:$0xff]  ;;  %v197_v30 = vld [vmem:[%s2043_s8 + $0x88] sm:$0xff] }
  0x25   : > { %v273_v44 = vsel %vm260_vm0, %v224_v41, 0.0  ;;  %v234_v49 = vmul.f32 %v2139_v46, %v2139_v46  ;;  %v254_v50 = vmul.f32 %v2142_v47, %v2142_v47  ;;  %v235_v57 = vmul.f32 %v2154_v54, %v2154_v54  ;;  %v217_v31 = vld [vmem:[%s2043_s8 + $0x128] sm:$0xff]  ;;  %v198_v41 = vld [vmem:[%s2043_s8 + $0x90] sm:$0xff] }
  0x26   : > { %v330_v51 = vsel %vm260_vm0, %v243_v48, 0.0  ;;  %v225_v58 = vmul.f32 %v2157_v55, %v2157_v55  ;;  %v244_v59 = vmul.f32 %v2160_v56, %v2160_v56  ;;  %v226_v5 = vmul.f32 %v2172_v63, %v2172_v63 }
  0x27   : > { %v303_v52 = vsel %vm260_vm0, %v234_v49, 0.0  ;;  %v363_v53 = vsel %vm260_vm0, %v254_v50, 0.0  ;;  %v306_v60 = vsel %vm260_vm0, %v235_v57, 0.0  ;;  %v255_v8 = vmul.f32 %v2175_v3, %v2175_v3  ;;  %v218_v57 = vld [vmem:[%s2043_s8 + $0x130] sm:$0xff] }
  0x28   : > { %265 = vadd.xlane.f32.xlu1 %v264_v15  ;;  %262 = vadd.xlane.f32.xlu0 %v261_v16  ;;  %v276_v61 = vsel %vm260_vm0, %v225_v58, 0.0  ;;  %v333_v62 = vsel %vm260_vm0, %v244_v59, 0.0  ;;  %v236_v9 = vmul.f32 %v2178_v4, %v2178_v4  ;;  %v279_v10 = vsel %vm260_vm0, %v226_v5, 0.0  ;;  %v205_v15 = vld [vmem:[%s2043_s8 + $0xc8] sm:$0xff]  ;;  %v187_v16 = vld [vmem:[%s2043_s8 + $0x38] sm:$0xff] }
  0x29   : > { %355 = vadd.xlane.f32.xlu2 %v354_v17  ;;  %v366_v12 = vsel %vm260_vm0, %v255_v8, 0.0  ;;  %v256_v17 = vmul.f32 %v216_v14, %v216_v14  ;;  %v245_v21 = vmul.f32 %v205_v15, %v205_v15  ;;  %v227_v22 = vmul.f32 %v187_v16, %v187_v16  ;;  %v199_v58 = vld [vmem:[%s2043_s8 + $0x98] sm:$0xff] }
  0x2a   : > { %v309_v13 = vsel %vm260_vm0, %v236_v9, 0.0  ;;  %v219_v9 = vld [vmem:[%s2043_s8 + $0x138] sm:$0xff] }
  0x2b   : > { %v369_v23 = vsel %vm260_vm0, %v256_v17, 0.0 }
  0x30   : > { %298 = vadd.xlane.f32.xlu1 %v297_v24  ;;  %268 = vadd.xlane.f32.xlu0 %v267_v25  ;;  %v336_v24 = vsel %vm260_vm0, %v245_v21, 0.0  ;;  %v282_v25 = vsel %vm260_vm0, %v227_v22, 0.0  ;;  %v200_v22 = vld [vmem:[%s2043_s8 + $0xa0] sm:$0xff] }
  0x31   : > { %325 = vadd.xlane.f32.xlu2 %v324_v26  ;;  %v206_v26 = vld [vmem:[%s2043_s8 + $0xd0] sm:$0xff] }
  0x32   : > { %v246_v32 = vmul.f32 %v206_v26, %v206_v26  ;;  %v861_v26 = vld [vmem:[%s3390_s2] sm:$0xff] }
  0x38   : > { %271 = vadd.xlane.f32.xlu1 %v270_v33  ;;  %358 = vadd.xlane.f32.xlu0 %v357_v34  ;;  %v237_v33 = vmul.f32 %v197_v30, %v197_v30  ;;  %v257_v34 = vmul.f32 %v217_v31, %v217_v31 }
  0x39   : > { %301 = vadd.xlane.f32.xlu2 %v300_v35  ;;  %v339_v35 = vsel %vm260_vm0, %v246_v32, 0.0 }
  0x3a   : > { %v312_v39 = vsel %vm260_vm0, %v237_v33, 0.0  ;;  %v372_v40 = vsel %vm260_vm0, %v257_v34, 0.0 }
  0x40   : > { %361 = vadd.xlane.f32.xlu1 %v360_v42  ;;  %328 = vadd.xlane.f32.xlu0 %v327_v43  ;;  %v188_v42 = vld [vmem:[%s2043_s8 + $0x40] sm:$0xff]  ;;  %v207_v43 = vld [vmem:[%s2043_s8 + $0xd8] sm:$0xff] }
  0x41   : > { %274 = vadd.xlane.f32.xlu2 %v273_v44  ;;  %v238_v44 = vmul.f32 %v198_v41, %v198_v41  ;;  %v228_v48 = vmul.f32 %v188_v42, %v188_v42  ;;  %v247_v49 = vmul.f32 %v207_v43, %v207_v43 }
  0x43   : > { %v315_v50 = vsel %vm260_vm0, %v238_v44, 0.0 }
  0x48   : > { %331 = vadd.xlane.f32.xlu1 %v330_v51  ;;  %304 = vadd.xlane.f32.xlu0 %v303_v52  ;;  %v285_v51 = vsel %vm260_vm0, %v228_v48, 0.0  ;;  %v342_v52 = vsel %vm260_vm0, %v247_v49, 0.0 }
  0x49   : > { %364 = vadd.xlane.f32.xlu2 %v363_v53  ;;  %v189_v53 = vld [vmem:[%s2043_s8 + $0x48] sm:$0xff] }
  0x4a   : > { %v229_v59 = vmul.f32 %v189_v53, %v189_v53 }
  0x50   : > { %307 = vadd.xlane.f32.xlu1 %v306_v60  ;;  %277 = vadd.xlane.f32.xlu0 %v276_v61  ;;  %v258_v60 = vmul.f32 %v218_v57, %v218_v57  ;;  %v239_v61 = vmul.f32 %v199_v58, %v199_v58 }
  0x51   : > { %334 = vadd.xlane.f32.xlu2 %v333_v62  ;;  %v288_v62 = vsel %vm260_vm0, %v229_v59, 0.0 }
  0x52   : > { %v375_v5 = vsel %vm260_vm0, %v258_v60, 0.0  ;;  %v318_v8 = vsel %vm260_vm0, %v239_v61, 0.0 }
  0x58   : > { %280 = vadd.xlane.f32.xlu1 %v279_v10  ;;  %367 = vadd.xlane.f32.xlu0 %v366_v12  ;;  %v208_v10 = vld [vmem:[%s2043_s8 + $0xe0] sm:$0xff]  ;;  %v190_v12 = vld [vmem:[%s2043_s8 + $0x50] sm:$0xff] }
  0x59   : > { %310 = vadd.xlane.f32.xlu2 %v309_v13  ;;  %v259_v13 = vmul.f32 %v219_v9, %v219_v9  ;;  %v248_v14 = vmul.f32 %v208_v10, %v208_v10  ;;  %v230_v15 = vmul.f32 %v190_v12, %v190_v12 }
  0x5b   : > { %v378_v16 = vsel %vm260_vm0, %v259_v13, 0.0  ;;  %v345_v17 = vsel %vm260_vm0, %v248_v14, 0.0  ;;  %v291_v21 = vsel %vm260_vm0, %v230_v15, 0.0 }
  0x60   : > { %370 = vadd.xlane.f32.xlu1 %v369_v23  ;;  %337 = vadd.xlane.f32.xlu0 %v336_v24  ;;  %v240_v23 = vmul.f32 %v200_v22, %v200_v22 }
  0x61   : > { %283 = vadd.xlane.f32.xlu2 %v282_v25  ;;  %v862_v25 = vld [vmem:[%s3390_s2 + $0x8] sm:$0xff] }
  0x62   : > { %v321_v24 = vsel %vm260_vm0, %v240_v23, 0.0  ;;  %1726 = vmatpush.msra.mxu1 %v862_v25  ;;  %1728 = vmatpush.msra.mxu3 %v862_v25 }
  0x63   : > { %997 = vmatpush.msra.mxu0 %v862_v25  ;;  %1727 = vmatpush.msra.mxu2 %v862_v25 }
  0x64   : > { %1729 = vmatpush.msra.mxu1 %v861_v26  ;;  %1731 = vmatpush.msra.mxu3 %v861_v26 }
  0x65   : > { %998 = vmatpush.msra.mxu0 %v861_v26  ;;  %1730 = vmatpush.msra.mxu2 %v861_v26 }
  0x68   : > { %340 = vadd.xlane.f32.xlu1 %v339_v35  ;;  %313 = vadd.xlane.f32.xlu0 %v312_v39 }
  0x69   : > { %373 = vadd.xlane.f32.xlu2 %v372_v40 }
  0x70   : > { %316 = vadd.xlane.f32.xlu1 %v315_v50  ;;  %286 = vadd.xlane.f32.xlu0 %v285_v51 }
  0x71   : > { %343 = vadd.xlane.f32.xlu2 %v342_v52 }
  0x78   : > { %289 = vadd.xlane.f32.xlu1 %v288_v62  ;;  %376 = vadd.xlane.f32.xlu0 %v375_v5 }
  0x79   : > { %319 = vadd.xlane.f32.xlu2 %v318_v8 }
  0x80   : > { %379 = vadd.xlane.f32.xlu1 %v378_v16  ;;  %346 = vadd.xlane.f32.xlu0 %v345_v17 }
  0x81   : > { %292 = vadd.xlane.f32.xlu2 %v291_v21 }
  0x88   : > { %322 = vadd.xlane.f32.xlu0 %v321_v24 }
  0x93   : > { %v353_v30 = vpop.xlane.xlu1 %352  ;;  %v350_v31 = vpop.xlane.xlu0 %349 }
  0x94   : > { %v2227_v32 = vadd.f32 1e-09, %v353_v30  ;;  %v410_v33 = vadd.f32 1e-09, %v350_v31  ;;  %v296_v34 = vpop.xlane.xlu2 %295 }
  0x95   : > { %v392_v35 = vadd.f32 1e-09, %v296_v34 }
  0x96   : > { %1772 = vrsqrt.f32 %v2227_v32  ;;  %vm717_vm4 = vweird.f32 %v410_v33  ;;  %vm727_vm6 = vweird.f32 %v2227_v32 }
  0x97   : > { %1774 = vrsqrt.f32 %v410_v33  ;;  %vm537_vm2 = vweird.f32 %v392_v35 }
  0x98   : > { %1776 = vrsqrt.f32 %v392_v35 }
  0x9b   : > { %v266_v39 = vpop.xlane.xlu1 %265  ;;  %v263_v40 = vpop.xlane.xlu0 %262 }
  0x9c   : > { %v2230_v41 = vpop.eup %1772  ;;  %v356_v42 = vpop.xlane.xlu2 %355  ;;  %v2232_v43 = vadd.f32 1e-09, %v266_v39  ;;  %v2234_v44 = vadd.f32 1e-09, %v263_v40 }
  0x9d   : > { %v1775_v48 = vpop.eup %1774  ;;  %v722_v49 = vmul.f32 %v2230_v41, %v2227_v32  ;;  %v2238_v50 = vadd.f32 1e-09, %v356_v42  ;;  %vm728_vm7 = vweird.f32 %v2230_v41 }
  0x9e   : > { %v1777_v51 = vpop.eup %1776  ;;  %v712_v52 = vmul.f32 %v1775_v48, %v410_v33  ;;  %1778 = vrsqrt.f32 %v2232_v43  ;;  %vm718_vm1 = vweird.f32 %v1775_v48  ;;  %vm437_vm9 = vweird.f32 %v2232_v43  ;;  %vm2307_vm11 = vmor %vm727_vm6, %vm728_vm7 }
  0x9f   : > { %v532_v53 = vmul.f32 %v1777_v51, %v392_v35  ;;  %1780 = vrsqrt.f32 %v2238_v50  ;;  %v723_v57 = vmul.f32 %v2230_v41, %v722_v49  ;;  %vm538_vm3 = vweird.f32 %v1777_v51  ;;  %vm2266_vm5 = vmor %vm717_vm4, %vm718_vm1 }
  0xa0   : > { %v713_v58 = vmul.f32 %v1775_v48, %v712_v52  ;;  %1782 = vrsqrt.f32 %v2234_v44  ;;  %vm539_vm8 = vmor %vm537_vm2, %vm538_vm3  ;;  %vm427_vm12 = vweird.f32 %v2234_v44  ;;  %vm737_vm14 = vweird.f32 %v2238_v50 }
  0xa1   : > { %v533_v59 = vmul.f32 %v1777_v51, %v532_v53  ;;  %v724_v9 = vmul.f32 0.5, %v723_v57 }
  0xa2   : > { %v714_v60 = vmul.f32 0.5, %v713_v58 }
  0xa3   : > { %v534_v61 = vmul.f32 0.5, %v533_v59  ;;  %v299_v62 = vpop.xlane.xlu1 %298  ;;  %v269_v5 = vpop.xlane.xlu0 %268  ;;  %v725_v26 = vsub.f32 1.5, %v724_v9 }
  0xa4   : > { %v2244_v8 = vpop.eup %1778  ;;  %v326_v10 = vpop.xlane.xlu2 %325  ;;  %v2246_v12 = vadd.f32 1e-09, %v299_v62  ;;  %v2248_v13 = vadd.f32 1e-09, %v269_v5  ;;  %v715_v15 = vsub.f32 1.5, %v714_v60 }
  0xa5   : > { %v2250_v14 = vpop.eup %1780  ;;  %v535_v16 = vsub.f32 1.5, %v534_v61  ;;  %v432_v17 = vmul.f32 %v2244_v8, %v2232_v43  ;;  %v2254_v21 = vadd.f32 1e-09, %v326_v10  ;;  %v726_v9 = vmul.f32 %v2230_v41, %v725_v26 }
  0xa6   : > { %v2256_v22 = vpop.eup %1782  ;;  %1784 = vrsqrt.f32 %v2246_v12  ;;  %v732_v25 = vmul.f32 %v2250_v14, %v2238_v50  ;;  %v716_v39 = vmul.f32 %v1775_v48, %v715_v15  ;;  %vm738_vm15 = vweird.f32 %v2250_v14 }
  0xa7   : > { %v433_v23 = vmul.f32 %v2244_v8, %v432_v17  ;;  %v422_v24 = vmul.f32 %v2256_v22, %v2234_v44  ;;  %1786 = vrsqrt.f32 %v2254_v21  ;;  %v536_v34 = vmul.f32 %v1777_v51, %v535_v16 }
  0xa8   : > { %1788 = vrsqrt.f32 %v2248_v13  ;;  %v720_v49 = vsel %vm2266_vm5, %v1775_v48, %v716_v39  ;;  %v733_v58 = vmul.f32 %v2250_v14, %v732_v25  ;;  %vm428_vm10 = vweird.f32 %v2256_v22 }
  0xa9   : > { %v423_v31 = vmul.f32 %v2256_v22, %v422_v24  ;;  %v434_v33 = vmul.f32 0.5, %v433_v23  ;;  %v540_v42 = vsel %vm539_vm8, %v1777_v51, %v536_v34  ;;  %v850_v60 = vmul.f32 %v720_v49, %v2049_v1  ;;  %vm429_vm13 = vmor %vm427_vm12, %vm428_vm10 }
  0xaa   : > { %v832_v59 = vmul.f32 %v540_v42, %v2052_v2  ;;  %v734_v26 = vmul.f32 0.5, %v733_v58  ;;  %v730_v32 = vsel %vm2307_vm11, %v2230_v41, %v726_v9  ;;  %vm438_vm1 = vweird.f32 %v2244_v8  ;;  %vm2381_vm10 = vmor %vm737_vm14, %vm738_vm15 }
  0xab   : > { %v424_v40 = vmul.f32 0.5, %v423_v31  ;;  %v272_v52 = vpop.xlane.xlu1 %271  ;;  %v359_v53 = vpop.xlane.xlu0 %358  ;;  %1706 = vmatmul.msk.f32.vlgmr.msra.gmra.mxu3 %vm260_vm0, %v850_v60  ;;  %v435_v2 = vsub.f32 1.5, %v434_v33  ;;  %vm2352_vm3 = vmor %vm437_vm9, %vm438_vm1  ;;  %vm637_vm4 = vweird.f32 %v2254_v21  ;;  %vm547_vm6 = vweird.f32 %v2246_v12 }
  0xac   : > { %v2276_v57 = vpop.eup %1784  ;;  %v302_v61 = vpop.xlane.xlu2 %301  ;;  %v2281_v62 = vadd.f32 1e-09, %v272_v52  ;;  %1688 = vmatmul.msk.f32.vlgmr.msra.gmra.mxu1 %vm260_vm0, %v832_v59  ;;  %v2313_v24 = vadd.f32 1e-09, %v359_v53  ;;  %v851_v52 = vmul.f32 %v730_v32, %v2046_v0  ;;  %v735_v60 = vsub.f32 1.5, %v734_v26 }
  0xad   : > { %v2283_v35 = vpop.eup %1786  ;;  %v425_v5 = vsub.f32 1.5, %v424_v40  ;;  %v542_v51 = vmul.f32 %v2276_v57, %v2246_v12  ;;  %v2287_v48 = vadd.f32 1e-09, %v302_v61  ;;  %v436_v42 = vmul.f32 %v2244_v8, %v435_v2 }
  0xae   : > { %v2290_v10 = vpop.eup %1788  ;;  %v632_v1 = vmul.f32 %v2283_v35, %v2254_v21  ;;  %1790 = vrsqrt.f32 %v2281_v62  ;;  %vm548_vm2 = vweird.f32 %v2276_v57  ;;  %vm638_vm5 = vweird.f32 %v2283_v35 }
  0xaf   : > { %v543_v15 = vmul.f32 %v2276_v57, %v542_v51  ;;  %v442_v16 = vmul.f32 %v2290_v10, %v2248_v13  ;;  %1792 = vrsqrt.f32 %v2287_v48  ;;  %v426_v25 = vmul.f32 %v2256_v22, %v425_v5  ;;  %vm549_vm7 = vmor %vm547_vm6, %vm548_vm2 }
  0xb0   : > { %v633_v23 = vmul.f32 %v2283_v35, %v632_v1  ;;  %1794 = vrsqrt.f32 %v2313_v24  ;;  %v440_v43 = vsel %vm2352_vm3, %v2244_v8, %v436_v42  ;;  %vm447_vm8 = vweird.f32 %v2248_v13  ;;  %vm639_vm9 = vmor %vm637_vm4, %vm638_vm5 }
  0xb1   : > { %v544_v30 = vmul.f32 0.5, %v543_v15  ;;  %v443_v31 = vmul.f32 %v2290_v10, %v442_v16  ;;  %v430_v34 = vsel %vm429_vm13, %v2256_v22, %v426_v25  ;;  %v736_v8 = vmul.f32 %v2250_v14, %v735_v60 }
  0xb2   : > { %v634_v44 = vmul.f32 0.5, %v633_v23  ;;  %v821_v39 = vmul.f32 %v430_v34, %v2064_v7  ;;  %vm448_vm11 = vweird.f32 %v2290_v10  ;;  %vm557_vm12 = vweird.f32 %v2287_v48 }
  0xb3   : > { %v362_v33 = vpop.xlane.xlu1 %361  ;;  %v329_v40 = vpop.xlane.xlu0 %328  ;;  %v545_v41 = vsub.f32 1.5, %v544_v30  ;;  %v444_v5 = vmul.f32 0.5, %v443_v31  ;;  %1707 = vmatmul.msk.f32.gmra.mxu3 %vm260_vm0, %v851_v52  ;;  %v822_v31 = vmul.f32 %v440_v43, %v2061_v6  ;;  %vm457_vm14 = vweird.f32 %v2281_v62  ;;  %vm2422_vm15 = vmor %vm447_vm8, %vm448_vm11 }
  0xb4   : > { %v2329_v49 = vpop.eup %1790  ;;  %v275_v53 = vpop.xlane.xlu2 %274  ;;  %v2332_v58 = vadd.f32 1e-09, %v362_v33  ;;  %v2334_v59 = vadd.f32 1e-09, %v329_v40  ;;  %v635_v61 = vsub.f32 1.5, %v634_v44  ;;  %1677 = vmatmul.msk.f32.vlgmr.msra.gmra.mxu0 %vm260_vm0, %v821_v39  ;;  %v740_v33 = vsel %vm2381_vm10, %v2250_v14, %v736_v8 }
  0xb5   : > { %v2336_v22 = vpop.eup %1792  ;;  %v2339_v7 = vadd.f32 1e-09, %v275_v53  ;;  %v452_v0 = vmul.f32 %v2329_v49, %v2281_v62  ;;  %v546_v15 = vmul.f32 %v2276_v57, %v545_v41  ;;  %v445_v21 = vsub.f32 1.5, %v444_v5 }
  0xb6   : > { %v552_v51 = vmul.f32 %v2336_v22, %v2287_v48  ;;  %1796 = vrsqrt.f32 %v2332_v58  ;;  %v2360_v1 = vpop.eup %1794  ;;  %v636_v16 = vmul.f32 %v2283_v35, %v635_v61  ;;  %v852_v41 = vmul.f32 %v740_v33, %v2070_v11 }
  0xb7   : > { %1798 = vrsqrt.f32 %v2339_v7  ;;  %v742_v12 = vmul.f32 %v2360_v1, %v2313_v24  ;;  %v453_v23 = vmul.f32 %v2329_v49, %v452_v0  ;;  %v550_v25 = vsel %vm549_vm7, %v2276_v57, %v546_v15 }
  0xb8   : > { %v553_v2 = vmul.f32 %v2336_v22, %v552_v51  ;;  %1800 = vrsqrt.f32 %v2334_v59  ;;  %v833_v32 = vmul.f32 %v550_v25, %v2082_v18  ;;  %v640_v44 = vsel %vm639_vm9, %v2283_v35, %v636_v16 }
  0xb9   : > { %v743_v30 = vmul.f32 %v2360_v1, %v742_v12  ;;  %v842_v50 = vmul.f32 %v640_v44, %v2088_v20  ;;  %v446_v20 = vmul.f32 %v2290_v10, %v445_v21  ;;  %vm558_vm13 = vweird.f32 %v2336_v22 }
  0xba   : > { %v554_v17 = vmul.f32 0.5, %v553_v2  ;;  %1689 = vmatmul.msk.f32.gmra.mxu1 %vm260_vm0, %v833_v32  ;;  %v454_v60 = vmul.f32 0.5, %v453_v23  ;;  %vm747_vm1 = vweird.f32 %v2313_v24  ;;  %vm748_vm2 = vweird.f32 %v2360_v1  ;;  %vm2442_vm3 = vmor %vm557_vm12, %vm558_vm13 }
  0xbb   : > { %v332_v34 = vpop.xlane.xlu1 %331  ;;  %v305_v57 = vpop.xlane.xlu0 %304  ;;  %v744_v18 = vmul.f32 0.5, %v743_v30  ;;  %1698 = vmatmul.msk.f32.vlgmr.msra.gmra.mxu2 %vm260_vm0, %v842_v50  ;;  %1708 = vmatmul.msk.f32.gmra.mxu3 %vm260_vm0, %v852_v41  ;;  %v450_v13 = vsel %vm2422_vm15, %v2290_v10, %v446_v20  ;;  %vm458_vm4 = vweird.f32 %v2329_v49  ;;  %vm647_vm5 = vweird.f32 %v2334_v59  ;;  %vm2450_vm6 = vmor %vm747_vm1, %vm748_vm2 }
  0xbc   : > { %v2389_v39 = vpop.eup %1796  ;;  %v365_v40 = vpop.xlane.xlu2 %364  ;;  %v2396_v42 = vadd.f32 1e-09, %v332_v34  ;;  %1678 = vmatmul.msk.f32.gmra.mxu0 %vm260_vm0, %v822_v31  ;;  %v555_v14 = vsub.f32 1.5, %v554_v17  ;;  %v2433_v2 = vadd.f32 1e-09, %v305_v57  ;;  %v455_v21 = vsub.f32 1.5, %v454_v60  ;;  %vm2491_vm11 = vmor %vm457_vm14, %vm458_vm4 }
  0xbd   : > { %v2398_v6 = vpop.eup %1798  ;;  %v752_v35 = vmul.f32 %v2389_v39, %v2332_v58  ;;  %v2410_v53 = vadd.f32 1e-09, %v365_v40  ;;  %v745_v61 = vsub.f32 1.5, %v744_v18  ;;  %v823_v48 = vmul.f32 %v450_v13, %v2085_v19 }
  0xbe   : > { %v2406_v52 = vpop.eup %1800  ;;  %1802 = vrsqrt.f32 %v2396_v42  ;;  %v462_v0 = vmul.f32 %v2398_v6, %v2339_v7  ;;  %v556_v43 = vmul.f32 %v2336_v22, %v555_v14  ;;  %vm757_vm7 = vweird.f32 %v2332_v58 }
  0xbf   : > { %v642_v11 = vmul.f32 %v2406_v52, %v2334_v59  ;;  %v753_v51 = vmul.f32 %v2389_v39, %v752_v35  ;;  %1804 = vrsqrt.f32 %v2410_v53  ;;  %v746_v15 = vmul.f32 %v2360_v1, %v745_v61 }
  0xc0   : > { %1806 = vrsqrt.f32 %v2433_v2  ;;  %v560_v8 = vsel %vm2442_vm3, %v2336_v22, %v556_v43  ;;  %v463_v19 = vmul.f32 %v2398_v6, %v462_v0  ;;  %vm648_vm8 = vweird.f32 %v2406_v52 }
  0xc1   : > { %v643_v9 = vmul.f32 %v2406_v52, %v642_v11  ;;  %v754_v25 = vmul.f32 0.5, %v753_v51  ;;  %v750_v26 = vsel %vm2450_vm6, %v2360_v1, %v746_v15  ;;  %v834_v34 = vmul.f32 %v560_v8, %v2106_v29  ;;  %vm649_vm13 = vmor %vm647_vm5, %vm648_vm8 }
  0xc2   : > { %v853_v22 = vmul.f32 %v750_v26, %v2103_v28  ;;  %vm467_vm9 = vweird.f32 %v2339_v7  ;;  %vm758_vm10 = vweird.f32 %v2389_v39  ;;  %v456_v18 = vmul.f32 %v2329_v49, %v455_v21 }
  0xc3   : > { %v644_v10 = vmul.f32 0.5, %v643_v9  ;;  %v308_v16 = vpop.xlane.xlu1 %307  ;;  %v278_v17 = vpop.xlane.xlu0 %277  ;;  %1690 = vmatmul.msk.f32.gmra.mxu1 %vm260_vm0, %v834_v34  ;;  %v755_v40 = vsub.f32 1.5, %v754_v25  ;;  %v464_v20 = vmul.f32 0.5, %v463_v19  ;;  %vm468_vm12 = vweird.f32 %v2398_v6  ;;  %vm759_vm2 = vmor %vm757_vm7, %vm758_vm10 }
  0xc4   : > { %v2456_v23 = vpop.eup %1802  ;;  %v335_v30 = vpop.xlane.xlu2 %334  ;;  %v2465_v31 = vadd.f32 1e-09, %v308_v16  ;;  %1679 = vmatmul.msk.f32.gmra.mxu0 %vm260_vm0, %v823_v48  ;;  %v2485_v29 = vadd.f32 1e-09, %v278_v17  ;;  %1709 = vmatmul.msk.f32.gmra.mxu3 %vm260_vm0, %v853_v22  ;;  %vm767_vm14 = vweird.f32 %v2410_v53  ;;  %v460_v61 = vsel %vm2491_vm11, %v2329_v49, %v456_v18  ;;  %vm2560_vm6 = vmor %vm467_vm9, %vm468_vm12 }
  0xc5   : > { %v645_v32 = vsub.f32 1.5, %v644_v10  ;;  %v652_v44 = vmul.f32 %v2456_v23, %v2396_v42  ;;  %v2472_v57 = vpop.eup %1804  ;;  %v2476_v1 = vadd.f32 1e-09, %v335_v30  ;;  %vm657_vm15 = vweird.f32 %v2396_v42 }
  0xc6   : > { %1808 = vrsqrt.f32 %v2465_v31  ;;  %v762_v50 = vmul.f32 %v2472_v57, %v2410_v53  ;;  %v2499_v41 = vpop.eup %1806  ;;  %v824_v59 = vmul.f32 %v460_v61, %v2100_v27  ;;  %vm567_vm1 = vweird.f32 %v2433_v2 }
  0xc7   : > { %v653_v33 = vmul.f32 %v2456_v23, %v652_v44  ;;  %1810 = vrsqrt.f32 %v2476_v1  ;;  %v646_v35 = vmul.f32 %v2406_v52, %v645_v32  ;;  %v562_v60 = vmul.f32 %v2499_v41, %v2433_v2 }
  0xc8   : > { %v763_v62 = vmul.f32 %v2472_v57, %v762_v50  ;;  %1812 = vrsqrt.f32 %v2485_v29  ;;  %v756_v43 = vmul.f32 %v2389_v39, %v755_v40  ;;  %vm568_vm3 = vweird.f32 %v2499_v41 }
  0xc9   : > { %v654_v14 = vmul.f32 0.5, %v653_v33  ;;  %v650_v11 = vsel %vm649_vm13, %v2406_v52, %v646_v35  ;;  %v563_v24 = vmul.f32 %v2499_v41, %v562_v60  ;;  %v465_v52 = vsub.f32 1.5, %v464_v20  ;;  %vm2569_vm7 = vmor %vm567_vm1, %vm568_vm3 }
  0xca   : > { %v764_v5 = vmul.f32 0.5, %v763_v62  ;;  %v843_v51 = vmul.f32 %v650_v11, %v2121_v37  ;;  %v760_v16 = vsel %vm759_vm2, %v2389_v39, %v756_v43  ;;  %vm768_vm4 = vweird.f32 %v2472_v57 }
  0xcb   : > { %v281_v0 = vpop.xlane.xlu1 %280  ;;  %v368_v9 = vpop.xlane.xlu0 %367  ;;  %v655_v10 = vsub.f32 1.5, %v654_v14  ;;  %v564_v48 = vmul.f32 0.5, %v563_v24  ;;  %v854_v26 = vmul.f32 %v760_v16, %v2118_v36  ;;  %vm658_vm5 = vweird.f32 %v2456_v23  ;;  %vm2597_vm11 = vmor %vm767_vm14, %vm768_vm4 }
  0xcc   : > { %v2518_v13 = vpop.eup %1808  ;;  %v311_v49 = vpop.xlane.xlu2 %310  ;;  %v2523_v15 = vadd.f32 1e-09, %v281_v0  ;;  %1680 = vmatmul.msk.f32.gmra.mxu0 %vm260_vm0, %v824_v59  ;;  %1699 = vmatmul.msk.f32.gmra.mxu2 %vm260_vm0, %v843_v51  ;;  %v2535_v21 = vadd.f32 1e-09, %v368_v9  ;;  %v765_v17 = vsub.f32 1.5, %v764_v5  ;;  %v466_v34 = vmul.f32 %v2398_v6, %v465_v52  ;;  %vm2583_vm10 = vmor %vm657_vm15, %vm658_vm5 }
  0xcd   : > { %v572_v27 = vmul.f32 %v2518_v13, %v2465_v31  ;;  %v2533_v37 = vadd.f32 1e-09, %v311_v49  ;;  %v2537_v12 = vpop.eup %1810  ;;  %v565_v30 = vsub.f32 1.5, %v564_v48  ;;  %1710 = vmatmul.msk.f32.gmra.mxu3 %vm260_vm0, %v854_v26  ;;  %vm667_vm8 = vweird.f32 %v2476_v1 }
  0xce   : > { %1814 = vrsqrt.f32 %v2523_v15  ;;  %v2541_v58 = vpop.eup %1812  ;;  %v662_v25 = vmul.f32 %v2537_v12, %v2476_v1  ;;  %vm577_vm9 = vweird.f32 %v2465_v31  ;;  %v656_v7 = vmul.f32 %v2456_v23, %v655_v10 }
  0xcf   : > { %v573_v8 = vmul.f32 %v2518_v13, %v572_v27  ;;  %v472_v19 = vmul.f32 %v2541_v58, %v2485_v29  ;;  %1816 = vrsqrt.f32 %v2533_v37  ;;  %v566_v22 = vmul.f32 %v2499_v41, %v565_v30 }
  0xd0   : > { %v663_v39 = vmul.f32 %v2537_v12, %v662_v25  ;;  %1818 = vrsqrt.f32 %v2535_v21  ;;  %v766_v33 = vmul.f32 %v2472_v57, %v765_v17  ;;  %v470_v62 = vsel %vm2560_vm6, %v2398_v6, %v466_v34 }
  0xd1   : > { %v574_v32 = vmul.f32 0.5, %v573_v8  ;;  %v473_v44 = vmul.f32 %v2541_v58, %v472_v19  ;;  %v570_v14 = vsel %vm2569_vm7, %v2499_v41, %v566_v22  ;;  %vm578_vm12 = vweird.f32 %v2518_v13 }
  0xd2   : > { %v664_v35 = vmul.f32 0.5, %v663_v39  ;;  %v825_v6 = vmul.f32 %v470_v62, %v2124_v38  ;;  %v835_v59 = vmul.f32 %v570_v14, %v2139_v46  ;;  %v660_v53 = vsel %vm2583_vm10, %v2456_v23, %v656_v7  ;;  %vm2643_vm15 = vmor %vm577_vm9, %vm578_vm12 }
  0xd3   : > { %v371_v28 = vpop.xlane.xlu1 %370  ;;  %v338_v40 = vpop.xlane.xlu0 %337  ;;  %v474_v20 = vmul.f32 0.5, %v473_v44  ;;  %v575_v41 = vsub.f32 1.5, %v574_v32  ;;  %v770_v51 = vsel %vm2597_vm11, %v2472_v57, %v766_v33  ;;  %v844_v46 = vmul.f32 %v660_v53, %v2136_v45 }
  0xd4   : > { %v2577_v18 = vpop.eup %1814  ;;  %v284_v60 = vpop.xlane.xlu2 %283  ;;  %v2605_v11 = vadd.f32 1e-09, %v371_v28  ;;  %1681 = vmatmul.msk.f32.gmra.mxu0 %vm260_vm0, %v825_v6  ;;  %v665_v43 = vsub.f32 1.5, %v664_v35  ;;  %1691 = vmatmul.msk.f32.gmra.mxu1 %vm260_vm0, %v835_v59  ;;  %v855_v57 = vmul.f32 %v770_v51, %v2142_v47  ;;  %vm478_vm13 = vweird.f32 %v2541_v58 }
  0xd5   : > { %v482_v61 = vmul.f32 %v2577_v18, %v2523_v15  ;;  %v2607_v5 = vpop.eup %1816  ;;  %v475_v9 = vsub.f32 1.5, %v474_v20  ;;  %v2627_v49 = vadd.f32 1e-09, %v284_v60  ;;  %1700 = vmatmul.msk.f32.gmra.mxu2 %vm260_vm0, %v844_v46  ;;  %vm668_vm14 = vweird.f32 %v2537_v12 }
  0xd6   : > { %v2616_v0 = vpop.eup %1818  ;;  %v582_v38 = vmul.f32 %v2607_v5, %v2533_v37  ;;  %1820 = vrsqrt.f32 %v2605_v11  ;;  %1711 = vmatmul.msk.f32.gmra.mxu3 %vm260_vm0, %v855_v57  ;;  %v2637_v47 = vadd.f32 1e-09, %v338_v40  ;;  %vm477_vm1 = vweird.f32 %v2485_v29  ;;  %vm669_vm3 = vmor %vm667_vm8, %vm668_vm14 }
  0xd7   : > { %v483_v24 = vmul.f32 %v2577_v18, %v482_v61  ;;  %v772_v23 = vmul.f32 %v2616_v0, %v2535_v21  ;;  %1822 = vrsqrt.f32 %v2627_v49  ;;  %v476_v16 = vmul.f32 %v2541_v58, %v475_v9  ;;  %vm479_vm2 = vmor %vm477_vm1, %vm478_vm13 }
  0xd8   : > { %v583_v52 = vmul.f32 %v2607_v5, %v582_v38  ;;  %v576_v17 = vmul.f32 %v2518_v13, %v575_v41  ;;  %1824 = vrsqrt.f32 %v2637_v47  ;;  %v666_v31 = vmul.f32 %v2537_v12, %v665_v43 }
  0xd9   : > { %v484_v27 = vmul.f32 0.5, %v483_v24  ;;  %v773_v45 = vmul.f32 %v2616_v0, %v772_v23  ;;  %vm487_vm4 = vweird.f32 %v2523_v15  ;;  %v480_v29 = vsel %vm479_vm2, %v2541_v58, %v476_v16 }
  0xda   : > { %v584_v48 = vmul.f32 0.5, %v583_v52  ;;  %v580_v39 = vsel %vm2643_vm15, %v2518_v13, %v576_v17  ;;  %vm488_vm5 = vweird.f32 %v2577_v18  ;;  %v826_v32 = vmul.f32 %v480_v29, %v2157_v55 }
  0xdb   : > { %v341_v25 = vpop.xlane.xlu1 %340  ;;  %v314_v8 = vpop.xlane.xlu0 %313  ;;  %v485_v26 = vsub.f32 1.5, %v484_v27  ;;  %v774_v30 = vmul.f32 0.5, %v773_v45  ;;  %v836_v44 = vmul.f32 %v580_v39, %v2154_v54  ;;  %v670_v34 = vsel %vm669_vm3, %v2537_v12, %v666_v31  ;;  %vm2689_vm7 = vmor %vm487_vm4, %vm488_vm5 }
  0xdc   : > { %v374_v19 = vpop.xlane.xlu2 %373  ;;  %v2669_v1 = vpop.eup %1820  ;;  %v585_v22 = vsub.f32 1.5, %v584_v48  ;;  %v845_v50 = vmul.f32 %v670_v34, %v2160_v56  ;;  %v2673_v58 = vadd.f32 1e-09, %v341_v25  ;;  %1682 = vmatmul.msk.f32.gmra.mxu0 %vm260_vm0, %v826_v32  ;;  %v2681_v54 = vadd.f32 1e-09, %v314_v8 }
  0xdd   : > { %v2663_v36 = vadd.f32 1e-09, %v374_v19  ;;  %v2675_v13 = vpop.eup %1822  ;;  %v775_v7 = vsub.f32 1.5, %v774_v30  ;;  %v782_v33 = vmul.f32 %v2669_v1, %v2605_v11  ;;  %1692 = vmatmul.msk.f32.gmra.mxu1 %vm260_vm0, %v836_v44  ;;  %v486_v55 = vmul.f32 %v2577_v18, %v485_v26 }
  0xde   : > { %vm587_vm6 = vweird.f32 %v2533_v37  ;;  %v492_v12 = vmul.f32 %v2675_v13, %v2627_v49  ;;  %1701 = vmatmul.msk.f32.gmra.mxu2 %vm260_vm0, %v845_v50  ;;  %v2697_v28 = vpop.eup %1824  ;;  %vm588_vm8 = vweird.f32 %v2607_v5  ;;  %vm777_vm9 = vweird.f32 %v2535_v21 }
  0xdf   : > { %1826 = vrsqrt.f32 %v2663_v36  ;;  %v783_v40 = vmul.f32 %v2669_v1, %v782_v33  ;;  %v490_v15 = vsel %vm2689_vm7, %v2577_v18, %v486_v55  ;;  %vm778_vm10 = vweird.f32 %v2616_v0  ;;  %vm589_vm12 = vmor %vm587_vm6, %vm588_vm8  ;;  %v1869_v33 = vld [vmem:[%s2043_s8 + $0xc8] sm:$0xff] }
  0xe0   : > { %1828 = vrsqrt.f32 %v2673_v58  ;;  %v493_v2 = vmul.f32 %v2675_v13, %v492_v12  ;;  %v672_v35 = vmul.f32 %v2697_v28, %v2637_v47  ;;  %vm497_vm11 = vweird.f32 %v2627_v49  ;;  %vm779_vm14 = vmor %vm777_vm9, %vm778_vm10 }
  0xe1   : > { %1830 = vrsqrt.f32 %v2681_v54  ;;  %v827_v14 = vmul.f32 %v490_v15, %v2172_v63  ;;  %v586_v60 = vmul.f32 %v2607_v5, %v585_v22  ;;  %v776_v42 = vmul.f32 %v2616_v0, %v775_v7  ;;  %v1868_v7 = vld [vmem:[%s2043_s8 + $0x38] sm:$0xff] }
  0xe2   : > { %v494_v6 = vmul.f32 0.5, %v493_v2  ;;  %v784_v41 = vmul.f32 0.5, %v783_v40  ;;  %vm787_vm13 = vweird.f32 %v2605_v11  ;;  %v673_v59 = vmul.f32 %v2697_v28, %v672_v35 }
  0xe3   : > { %v317_v20 = vpop.xlane.xlu1 %316  ;;  %v287_v62 = vpop.xlane.xlu0 %286  ;;  %vm498_vm15 = vweird.f32 %v2675_v13  ;;  %v590_v37 = vsel %vm589_vm12, %v2607_v5, %v586_v60  ;;  %v780_v46 = vsel %vm779_vm14, %v2616_v0, %v776_v42  ;;  %vm678_vm1 = vweird.f32 %v2697_v28 }
  0xe4   : > { %v344_v18 = vpop.xlane.xlu2 %343  ;;  %v2732_v51 = vadd.f32 1e-09, %v317_v20  ;;  %v674_v38 = vmul.f32 0.5, %v673_v59  ;;  %v837_v24 = vmul.f32 %v590_v37, %v2178_v4  ;;  %v2738_v43 = vadd.f32 1e-09, %v287_v62  ;;  %1683 = vmatmul.msk.f32.gmra.mxu0 %vm260_vm0, %v827_v14  ;;  %vm2765_vm4 = vmor %vm497_vm11, %vm498_vm15 }
  0xe5   : > { %v2714_v61 = vpop.eup %1826  ;;  %v2722_v53 = vadd.f32 1e-09, %v344_v18  ;;  %v495_v23 = vsub.f32 1.5, %v494_v6  ;;  %v856_v5 = vmul.f32 %v780_v46, %v2175_v3  ;;  %v785_v27 = vsub.f32 1.5, %v784_v41 }
  0xe6   : > { %v792_v63 = vmul.f32 %v2714_v61, %v2663_v36  ;;  %v2734_v9 = vpop.eup %1828  ;;  %v675_v45 = vsub.f32 1.5, %v674_v38  ;;  %1693 = vmatmul.msk.f32.gmra.mxu1 %vm260_vm0, %v837_v24  ;;  %vm788_vm2 = vweird.f32 %v2669_v1  ;;  %vm677_vm3 = vweird.f32 %v2637_v47 }
  0xe7   : > { %v2740_v21 = vpop.eup %1830  ;;  %v682_v52 = vmul.f32 %v2734_v9, %v2673_v58  ;;  %1832 = vrsqrt.f32 %v2722_v53  ;;  %1712 = vmatmul.msk.f32.gmra.mxu3 %vm260_vm0, %v856_v5  ;;  %vm797_vm5 = vweird.f32 %v2663_v36  ;;  %vm687_vm6 = vweird.f32 %v2673_v58  ;;  %vm679_vm7 = vmor %vm677_vm3, %vm678_vm1 }
  0xe8   : > { %v793_v57 = vmul.f32 %v2714_v61, %v792_v63  ;;  %v592_v4 = vmul.f32 %v2740_v21, %v2681_v54  ;;  %1834 = vrsqrt.f32 %v2732_v51  ;;  %v496_v47 = vmul.f32 %v2675_v13, %v495_v23  ;;  %vm2784_vm8 = vmor %vm787_vm13, %vm788_vm2 }
  0xe9   : > { %v683_v10 = vmul.f32 %v2734_v9, %v682_v52  ;;  %1836 = vrsqrt.f32 %v2738_v43  ;;  %v676_v8 = vmul.f32 %v2697_v28, %v675_v45  ;;  %v786_v30 = vmul.f32 %v2669_v1, %v785_v27 }
  0xea   : > { %v2752_v0 = vmul.f32 0.5, %v793_v57  ;;  %v593_v3 = vmul.f32 %v2740_v21, %v592_v4  ;;  %v500_v32 = vsel %vm2765_vm4, %v2675_v13, %v496_v47  ;;  %vm597_vm9 = vweird.f32 %v2681_v54  ;;  %v1871_v57 = vld [vmem:[%s2043_s8 + $0x88] sm:$0xff] }
  0xeb   : > { %v290_v48 = vpop.xlane.xlu1 %289  ;;  %v377_v16 = vpop.xlane.xlu0 %376  ;;  %v684_v25 = vmul.f32 0.5, %v683_v10  ;;  %v680_v44 = vsel %vm679_vm7, %v2697_v28, %v676_v8  ;;  %v828_v11 = vmul.f32 %v1868_v7, %v500_v32  ;;  %v790_v56 = vsel %vm2784_vm8, %v2669_v1, %v786_v30  ;;  %v1870_v28 = vld [vmem:[%s2043_s8 + $0x120] sm:$0xff] }
  0xec   : > { %v320_v26 = vpop.xlane.xlu2 %319  ;;  %v594_v49 = vmul.f32 0.5, %v593_v3  ;;  %v2778_v19 = vadd.f32 1e-09, %v290_v48  ;;  %v795_v39 = vsub.f32 1.5, %v2752_v0  ;;  %v2793_v34 = vadd.f32 1e-09, %v377_v16 }
  0xed   : > { %v2776_v31 = vadd.f32 1e-09, %v320_v26  ;;  %v2795_v22 = vpop.eup %1832  ;;  %v846_v55 = vmul.f32 %v1869_v33, %v680_v44  ;;  %v685_v40 = vsub.f32 1.5, %v684_v25  ;;  %v857_v15 = vmul.f32 %v1870_v28, %v790_v56  ;;  %1684 = vmatmul.msk.f32.gmra.mxu0 %vm260_vm0, %v828_v11  ;;  %v1873_v25 = vld [vmem:[%s2043_s8 + $0x128] sm:$0xff]  ;;  %v1875_v28 = vld [vmem:[%s2043_s8 + $0x90] sm:$0xff] }
  0xee   : > { %v595_v50 = vsub.f32 1.5, %v594_v49  ;;  %v2802_v12 = vpop.eup %1834  ;;  %v692_v13 = vmul.f32 %v2795_v22, %v2722_v53  ;;  %vm598_vm10 = vweird.f32 %v2740_v21  ;;  %vm798_vm11 = vweird.f32 %v2714_v61 }
  0xef   : > { %1838 = vrsqrt.f32 %v2776_v31  ;;  %v2808_v2 = vpop.eup %1836  ;;  %v602_v35 = vmul.f32 %v2802_v12, %v2732_v51  ;;  %1702 = vmatmul.msk.f32.gmra.mxu2 %vm260_vm0, %v846_v55  ;;  %vm688_vm12 = vweird.f32 %v2734_v9  ;;  %1713 = vmatmul.msk.f32.gmra.mxu3 %vm260_vm0, %v857_v15  ;;  %vm697_vm13 = vweird.f32 %v2722_v53  ;;  %vm599_vm14 = vmor %vm597_vm9, %vm598_vm10 }
  0xf0   : > { %1840 = vrsqrt.f32 %v2778_v19  ;;  %v693_v1 = vmul.f32 %v2795_v22, %v692_v13  ;;  %v502_v20 = vmul.f32 %v2808_v2, %v2738_v43  ;;  %v596_v14 = vmul.f32 %v2740_v21, %v595_v50  ;;  %vm2839_vm1 = vmor %vm687_vm6, %vm688_vm12 }
  0xf1   : > { %v603_v62 = vmul.f32 %v2802_v12, %v602_v35  ;;  %1842 = vrsqrt.f32 %v2793_v34  ;;  %vm607_vm15 = vweird.f32 %v2732_v51  ;;  %v686_v41 = vmul.f32 %v2734_v9, %v685_v40  ;;  %vm2861_vm3 = vmor %vm797_vm5, %vm798_vm11  ;;  %v1874_v51 = vld [vmem:[%s2043_s8 + $0x40] sm:$0xff] }
  0xf2   : > { %v694_v18 = vmul.f32 0.5, %v693_v1  ;;  %v503_v6 = vmul.f32 %v2808_v2, %v502_v20  ;;  %v796_v59 = vmul.f32 %v2714_v61, %v795_v39  ;;  %vm507_vm2 = vweird.f32 %v2738_v43 }
  0xf3   : > { %v380_v60 = vpop.xlane.xlu1 %379  ;;  %v347_v42 = vpop.xlane.xlu0 %346  ;;  %v604_v54 = vmul.f32 0.5, %v603_v62  ;;  %v600_v38 = vsel %vm599_vm14, %v2740_v21, %v596_v14  ;;  %v690_v58 = vsel %vm2839_vm1, %v2734_v9, %v686_v41  ;;  %vm698_vm4 = vweird.f32 %v2795_v22  ;;  %v1872_v9 = vld [vmem:[%s2043_s8 + $0xd0] sm:$0xff]  ;;  %v1876_v62 = vld [vmem:[%s2043_s8 + $0xd8] sm:$0xff] }
  0xf4   : > { %v293_v63 = vpop.xlane.xlu2 %292  ;;  %v504_v23 = vmul.f32 0.5, %v503_v6  ;;  %v838_v52 = vmul.f32 %v1871_v57, %v600_v38  ;;  %v2853_v5 = vadd.f32 1e-09, %v380_v60  ;;  %v695_v45 = vsub.f32 1.5, %v694_v18  ;;  %vm2910_vm11 = vmor %vm697_vm13, %vm698_vm4  ;;  %v1877_v38 = vld [vmem:[%s2043_s8 + $0x48] sm:$0xff]  ;;  %v1879_v21 = vld [vmem:[%s2043_s8 + $0x130] sm:$0xff] }
  0xf5   : > { %v2845_v24 = vadd.f32 1e-09, %v293_v63  ;;  %v2847_v46 = vpop.eup %1838  ;;  %v847_v0 = vmul.f32 %v1872_v9, %v690_v58  ;;  %v605_v10 = vsub.f32 1.5, %v604_v54  ;;  %v800_v36 = vsel %vm2861_vm3, %v2714_v61, %v796_v59 }
  0xf6   : > { %v2855_v27 = vpop.eup %1840  ;;  %v612_v4 = vmul.f32 %v2847_v46, %v2776_v31  ;;  %v505_v3 = vsub.f32 1.5, %v504_v23  ;;  %1694 = vmatmul.msk.f32.gmra.mxu1 %vm260_vm0, %v838_v52  ;;  %vm508_vm5 = vweird.f32 %v2808_v2  ;;  %v858_v47 = vmul.f32 %v1873_v25, %v800_v36  ;;  %v1878_v23 = vld [vmem:[%s2043_s8 + $0x98] sm:$0xff]  ;;  %v1880_v25 = vld [vmem:[%s2043_s8 + $0x50] sm:$0xff] }
  0xf7   : > { %v512_v48 = vmul.f32 %v2855_v27, %v2778_v19  ;;  %v2875_v16 = vpop.eup %1842  ;;  %1703 = vmatmul.msk.f32.gmra.mxu2 %vm260_vm0, %v847_v0  ;;  %1844 = vrsqrt.f32 %v2845_v24  ;;  %vm608_vm6 = vweird.f32 %v2802_v12  ;;  %vm617_vm7 = vweird.f32 %v2776_v31  ;;  %vm509_vm8 = vmor %vm507_vm2, %vm508_vm5 }
  0xf8   : > { %v613_v17 = vmul.f32 %v2847_v46, %v612_v4  ;;  %v802_v26 = vmul.f32 %v2875_v16, %v2793_v34  ;;  %1846 = vrsqrt.f32 %v2853_v5  ;;  %1714 = vmatmul.msk.f32.gmra.mxu3 %vm260_vm0, %v858_v47  ;;  %v2889_v49 = vadd.f32 1e-09, %v347_v42  ;;  %vm609_vm9 = vmor %vm607_vm15, %vm608_vm6 }
  0xf9   : > { %v513_v8 = vmul.f32 %v2855_v27, %v512_v48  ;;  %v506_v30 = vmul.f32 %v2808_v2, %v505_v3  ;;  %v606_v32 = vmul.f32 %v2802_v12, %v605_v10  ;;  %v696_v44 = vmul.f32 %v2795_v22, %v695_v45 }
  0xfa   : > { %v614_v61 = vmul.f32 0.5, %v613_v17  ;;  %v803_v39 = vmul.f32 %v2875_v16, %v802_v26  ;;  %vm618_vm10 = vweird.f32 %v2847_v46  ;;  %1848 = vrsqrt.f32 %v2889_v49  ;;  %v1881_v26 = vld [vmem:[%s2043_s8 + $0x138] sm:$0xff] }
  0xfb   : > { %v514_v29 = vmul.f32 0.5, %v513_v8  ;;  %v323_v50 = vpop.xlane.xlu0 %322  ;;  %v510_v43 = vsel %vm509_vm8, %v2808_v2, %v506_v30  ;;  %v610_v40 = vsel %vm609_vm9, %v2802_v12, %v606_v32  ;;  %v700_v2 = vsel %vm2910_vm11, %v2795_v22, %v696_v44  ;;  %vm2936_vm13 = vmor %vm617_vm7, %vm618_vm10  ;;  %v1883_v44 = vld [vmem:[%s2043_s8 + $0xa0] sm:$0xff] }
  0xfc   : > { %v615_v7 = vsub.f32 1.5, %v614_v61  ;;  %v804_v55 = vmul.f32 0.5, %v803_v39  ;;  %v829_v56 = vmul.f32 %v1874_v51, %v510_v43  ;;  %v839_v15 = vmul.f32 %v1875_v28, %v610_v40 }
  0xfd   : > { %v515_v33 = vsub.f32 1.5, %v514_v29  ;;  %v2916_v13 = vpop.eup %1844  ;;  %v2922_v53 = vadd.f32 1e-09, %v323_v50  ;;  %vm518_vm12 = vweird.f32 %v2855_v27  ;;  %v848_v14 = vmul.f32 %v1876_v62, %v700_v2  ;;  %v1882_v29 = vld [vmem:[%s2043_s8 + $0xe0] sm:$0xff]  ;;  %s3021_s8 = sld [smem:[#allocation4 + %s1355_s6]] }
  0xfe   : > { %v616_v35 = vmul.f32 %v2847_v46, %v615_v7  ;;  %v2925_v1 = vpop.eup %1846  ;;  %v805_v20 = vsub.f32 1.5, %v804_v55  ;;  %v522_v12 = vmul.f32 %v2916_v13, %v2845_v24  ;;  %1685 = vmatmul.msk.f32.gmra.mxu0 %vm260_vm0, %v829_v56  ;;  %vm517_vm14 = vweird.f32 %v2778_v19  ;;  %1695 = vmatmul.msk.f32.gmra.mxu1 %vm260_vm0, %v839_v15 }
  0xff   : > { %vm808_vm15 = vweird.f32 %v2875_v16  ;;  %v812_v60 = vmul.f32 %v2925_v1, %v2853_v5  ;;  %1850 = vrsqrt.f32 %v2922_v53  ;;  %1704 = vmatmul.msk.f32.gmra.mxu2 %vm260_vm0, %v848_v14  ;;  %v516_v31 = vmul.f32 %v2855_v27, %v515_v33  ;;  %vm519_vm1 = vmor %vm517_vm14, %vm518_vm12 }
 0x100   : > { %v523_v42 = vmul.f32 %v2916_v13, %v522_v12  ;;  %v620_v19 = vsel %vm2936_vm13, %v2847_v46, %v616_v35  ;;  %v806_v18 = vmul.f32 %v2875_v16, %v805_v20  ;;  %v1849_v6 = vpop.eup %1848  ;;  %vm807_vm2 = vweird.f32 %v2793_v34  ;;  %v1520_v35 = vld [vmem:[%s3391_s3 + $0x30] sm:$0xff] }
 0x101   : > { %v813_v41 = vmul.f32 %v2925_v1, %v812_v60  ;;  %vm809_vm3 = vmor %vm807_vm2, %vm808_vm15  ;;  %vm527_vm4 = vweird.f32 %v2845_v24  ;;  %v702_v63 = vmul.f32 %v1849_v6, %v2889_v49  ;;  %v520_v37 = vsel %vm519_vm1, %v2855_v27, %v516_v31  ;;  %1565 = vmatpush.msrb.mxu1 %v1520_v35 }
 0x102   : > { %v524_v59 = vmul.f32 0.5, %v523_v42  ;;  %v830_v46 = vmul.f32 %v1877_v38, %v520_v37  ;;  %v840_v57 = vmul.f32 %v1878_v23, %v620_v19  ;;  %v810_v52 = vsel %vm809_vm3, %v2875_v16, %v806_v18 }
 0x103   : > { %v814_v54 = vmul.f32 0.5, %v813_v41  ;;  %vm528_vm5 = vweird.f32 %v2916_v13  ;;  %v703_v34 = vmul.f32 %v1849_v6, %v702_v63  ;;  %v859_v45 = vmul.f32 %v1879_v21, %v810_v52  ;;  %s1357_s17 = scvt.s32.f32 %s3021_s8 }
 0x104   : > { %v525_v58 = vsub.f32 1.5, %v524_v59  ;;  %vm818_vm6 = vweird.f32 %v2925_v1  ;;  %vm529_vm7 = vmor %vm527_vm4, %vm528_vm5  ;;  %vm817_vm8 = vweird.f32 %v2853_v5  ;;  %vm708_vm10 = vweird.f32 %v1849_v6 }
 0x105   : > { %v1851_v4 = vpop.eup %1850  ;;  %v815_v9 = vsub.f32 1.5, %v814_v54  ;;  %v704_v27 = vmul.f32 0.5, %v703_v34  ;;  %1715 = vmatmul.msk.f32.gmra.mxu3 %vm260_vm0, %v859_v45  ;;  %vm819_vm9 = vmor %vm817_vm8, %vm818_vm6  ;;  %vm707_vm11 = vweird.f32 %v2889_v49  ;;  %vm627_vm14 = vweird.f32 %v2922_v53  ;;  %v1521_v54 = vld [vmem:[%s3391_s3 + $0x38] sm:$0xff] }
 0x106   : > { %v526_v0 = vmul.f32 %v2916_v13, %v525_v58  ;;  %v622_v10 = vmul.f32 %v1851_v4, %v2922_v53  ;;  %1686 = vmatmul.msk.f32.gmra.mxu0 %vm260_vm0, %v830_v46  ;;  %1696 = vmatmul.msk.f32.gmra.mxu1 %vm260_vm0, %v840_v57  ;;  %vm709_vm12 = vmor %vm707_vm11, %vm708_vm10  ;;  %vm628_vm13 = vweird.f32 %v1851_v4  ;;  %vm1120_vm1 = vcmask 261120  }
 0x107   : > { %v816_v3 = vmul.f32 %v2925_v1, %v815_v9  ;;  %v705_v48 = vsub.f32 1.5, %v704_v27  ;;  %vm629_vm15 = vmor %vm627_vm14, %vm628_vm13  ;;  %v1329_v53 = vlaneseq  ;;  %v1334_v12 = vstv %s1333_s30  ;;  %1585 = vmatpush.msrb.mxu2 %v1521_v54  ;;  %s1375_s30 = scvt.s32.f32 %s3039_s18  ;;  %s171_s18 = sand.u32 1, %s1952_s20  }
 0x108   : > { %v623_v36 = vmul.f32 %v1851_v4, %v622_v10  ;;  %v530_v16 = vsel %vm529_vm7, %v2916_v13, %v526_v0  ;;  %v1340_v42 = vstv %s1339_s7  ;;  %v1346_v19 = vstv %s1345_s10  ;;  %s1596_s8 = scalar_lea.sflag [#allocation6], %s171_s18 }
 0x109   : > { %v820_v17 = vsel %vm819_vm9, %v2925_v1, %v816_v3  ;;  %v831_v47 = vmul.f32 %v1880_v25, %v530_v16  ;;  %v706_v8 = vmul.f32 %v1849_v6, %v705_v48  ;;  %v3013_v1 = vshrl.u32 %v1329_v53, 7  ;;  %v1514_v53 = vld [vmem:[%s3391_s3] sm:$0xff] }
 0x10a   : > { %v624_v24 = vmul.f32 0.5, %v623_v36  ;;  %v860_v5 = vmul.f32 %v1881_v26, %v820_v17  ;;  %v1352_v41 = vstv %s1351_s14  ;;  %v1358_v46 = vstv %s1357_s17 }
 0x10b   : > { %v710_v30 = vsel %vm709_vm12, %v1849_v6, %v706_v8  ;;  %vm1336_vm2 = vcmp.eq.s32.totalorder %v3013_v1, 1  ;;  %vm1342_vm3 = vcmp.eq.s32.totalorder %v3013_v1, 2  ;;  %vm1348_vm4 = vcmp.eq.s32.totalorder %v3013_v1, 3 }
 0x10c   : > { %v625_v61 = vsub.f32 1.5, %v624_v24  ;;  %v849_v39 = vmul.f32 %v1882_v29, %v710_v30  ;;  %vm1354_vm5 = vcmp.eq.s32.totalorder %v3013_v1, 4  ;;  %vm1360_vm6 = vcmp.eq.s32.totalorder %v3013_v1, 5  ;;  %v1519_v30 = vld [vmem:[%s3391_s3 + $0x28] sm:$0xff] }
 0x10d   : > { %1716 = vmatmul.msk.f32.gmra.mxu3 %vm260_vm0, %v860_v5  ;;  %v1364_v57 = vstv %s1363_s23  ;;  %vm1366_vm7 = vcmp.eq.s32.totalorder %v3013_v1, 6  ;;  %vm1372_vm8 = vcmp.eq.s32.totalorder %v3013_v1, 7  ;;  %v1376_v10 = vstv %s1375_s30  ;;  %1586 = vmatpush.msrb.mxu2 %v1519_v30  ;;  %s1675_s23 = sshll.u32 %s171_s18, 4  ;;  %s1607_s30 = scalar_lea.hbm %s3392_s4, %s1725_s25 }
 0x10e   : > { %v626_v32 = vmul.f32 %v1851_v4, %v625_v61  ;;  %1687 = vmatmul.msk.f32.gmra.mxu0 %vm260_vm0, %v831_v47  ;;  %1705 = vmatmul.msk.f32.gmra.mxu2 %vm260_vm0, %v849_v39  ;;  %v1518_v61 = vld [vmem:[%s3391_s3 + $0x20] sm:$0xff]  ;;  %s173_s5 = scalar_lea.vmem [#allocation5], %s1675_s23  ;;  %s1611_s7 = sshll.u32 %s1607_s30, 4  ;;  %s1612_s7 = int_to_ptr.hbm [resolvable:$true] %s1611_s7 }
 0x10f   : > { %1566 = vmatpush.msrb.mxu1 %v1518_v61  ;;  %s1609_s6 = sshll.u32 %s173_s5, 4  ;;  %s1910_s9 = sshra.s32 %s1612_s7, 4  ;;  %s1610_s6 = int_to_ptr.vmem [resolvable:$true] %s1609_s6  ;;  %s1911_s9 = int_to_ptr.hbm [resolvable:$true] %s1910_s9 }
 0x110   : > { %v630_v49 = vsel %vm629_vm15, %v1851_v4, %v626_v32  ;;  %v1370_v4 = vstv %s1369_s26  ;;  %s1912_s10 = scalar_lea.hbm %s1911_s9, 16  ;;  %p1917_p0 = scmp.lt.s32.totalorder %s1911_s9, %s3392_s4 }
 0x111   : > { %v841_v50 = vmul.f32 %v1883_v44, %v630_v49  ;;  %p1913_p11 = scmp.ne.s32.totalorder %s1911_s9, %s1912_s10  ;;  %p1918_p1 = scmp.lt.s32.totalorder %s1916_s12, %s1912_s10 }
 0x113   : > { %1697 = vmatmul.msk.f32.gmra.mxu1 %vm260_vm0, %v841_v50  ;;  %vm1331_vm0 = vcmp.eq.s32.totalorder %v3013_v1, 0  ;;  %p1914_p12 = pnand %p1913_p11, %p2029_p5  ;;  %p1919_p2 = por %p1918_p1, %p1917_p0 }
 0x114   : > { %v1335_v60 = vsel %vm1331_vm0, %v1334_v12, 1.0 }
 0x115   : > { %v1341_v31 = vsel %vm1336_vm2, %v1340_v42, %v1335_v60  ;;  %p1915_p13 = pneg %p1914_p12 }
 0x116   : > { %v1347_v6 = vsel %vm1342_vm3, %v1346_v19, %v1341_v31 }
 0x117   : > { %v1353_v38 = vsel %vm1348_vm4, %v1352_v41, %v1347_v6  ;;  %p1920_p3 = pnand %p1919_p2, %p1915_p13 }
 0x118   : > { %v1359_v23 = vsel %vm1354_vm5, %v1358_v46, %v1353_v38 }
 0x119   : > { %v1365_v45 = vsel %vm1360_vm6, %v1364_v57, %v1359_v23 }
 0x11a   : > { %v1371_v27 = vsel %vm1366_vm7, %v1370_v4, %v1365_v45 }
 0x11b   : > { %v3058_v16 = vsel %vm1372_vm8, %v1376_v10, %v1371_v27 }
 0x11c   : > { %v3061_v25 = vrot.slane %v3058_v16, 6  ;;  %1852 = vrcp.f32 %v3058_v16  ;;  %v3112_v41 = vrot.slane %v3058_v16, 2  ;;  %vm1399_vm9 = vweird.f32 %v3058_v16 }
 0x11d   : > { %v1405_v57 = vand.u32 2147483648, %v3058_v16  ;;  %v3160_v30 = vrot.slane %v3058_v16, 5 }
 0x11e   : > { %1854 = vrcp.f32 %v3061_v25  ;;  %vm1489_vm11 = vweird.f32 %v3061_v25  ;;  %vm1429_vm7 = vweird.f32 %v3112_v41 }
 0x122   : > { %v3073_v49 = vpop.eup %1852 }
 0x123   : > { %vm1400_vm10 = vweird.f32 %v3073_v49 }
 0x124   : > { %vm3131_vm13 = vmor %vm1399_vm9, %vm1400_vm10 }
 0x129   : > { %v1033_v7 = vpop.f32.mrf.mxu1 }
 0x12a   : > { %1132 = vst.msk [vmem:[#allocation2 + $0x58] sm:$0xff] %vm1120_vm1, %v1033_v7 }
 0x12e   : > { %v1087_v43 = vpop.f32.mrf.mxu3 }
 0x12f   : > { %1150 = vst.msk [vmem:[#allocation2 + $0xe8] sm:$0xff] %vm1120_vm1, %v1087_v43 }
 0x131   : > { %v1000_v11 = vpop.f32.mrf.mxu0 }
 0x132   : > { %1121 = vst.msk [vmem:[#allocation2] sm:$0xff] %vm1120_vm1, %v1000_v11 }
 0x136   : > { %v1090_v33 = vpop.f32.mrf.mxu3 }
 0x137   : > { %1151 = vst.msk [vmem:[#allocation2 + $0xf0] sm:$0xff] %vm1120_vm1, %v1090_v33  ;;  %v1036_v51 = vpop.f32.mrf.mxu1 }
 0x138   : > { %1133 = vst.msk [vmem:[#allocation2 + $0x60] sm:$0xff] %vm1120_vm1, %v1036_v51  ;;  %v3081_v51 = vrot.slane %v3058_v16, 1 }
 0x139   : > { %v1003_v55 = vpop.f32.mrf.mxu0 }
 0x13a   : > { %1122 = vst.msk [vmem:[#allocation2 + $0x8] sm:$0xff] %vm1120_vm1, %v1003_v55  ;;  %v3077_v55 = vpop.eup %1854  ;;  %1856 = vrcp.f32 %v3081_v51  ;;  %vm1414_vm2 = vweird.f32 %v3081_v51 }
 0x13b   : > { %vm1490_vm12 = vweird.f32 %v3077_v55 }
 0x13c   : > { %vm3149_vm14 = vmor %vm1489_vm11, %vm1490_vm12 }
 0x13e   : > { %v1063_v56 = vpop.f32.mrf.mxu2  ;;  %v1093_v40 = vpop.f32.mrf.mxu3 }
 0x13f   : > { %1142 = vst.msk [vmem:[#allocation2 + $0xa8] sm:$0xff] %vm1120_vm1, %v1063_v56  ;;  %v3084_v56 = vrot.slane %v3058_v16, 3 }
 0x140   : > { %1152 = vst.msk [vmem:[#allocation2 + $0xf8] sm:$0xff] %vm1120_vm1, %v1093_v40  ;;  %v1039_v28 = vpop.f32.mrf.mxu1  ;;  %v1395_v40 = vmul.f32 %v3073_v49, %v3058_v16 }
 0x141   : > { %v1006_v13 = vpop.f32.mrf.mxu0  ;;  %1134 = vst.msk [vmem:[#allocation2 + $0x68] sm:$0xff] %vm1120_vm1, %v1039_v28  ;;  %v1517_v28 = vld [vmem:[%s3391_s3 + $0x18] sm:$0xff]  ;;  %1858 = vrcp.f32 %v3084_v56  ;;  %vm1444_vm4 = vweird.f32 %v3084_v56 }
 0x142   : > { %1123 = vst.msk [vmem:[#allocation2 + $0x10] sm:$0xff] %vm1120_vm1, %v1006_v13  ;;  %v1516_v13 = vld [vmem:[%s3391_s3 + $0x10] sm:$0xff]  ;;  %1587 = vmatpush.msrb.mxu2 %v1517_v28  ;;  %1860 = vrcp.f32 %v3112_v41 }
 0x143   : > { %1567 = vmatpush.msrb.mxu1 %v1516_v13 }
 0x145   : > { %1568 = vmatpush.msrb.mxu1 %v1514_v53 }
 0x147   : > { %v1096_v2 = vpop.f32.mrf.mxu3 }
 0x148   : > { %1153 = vst.msk [vmem:[#allocation2 + $0x100] sm:$0xff] %vm1120_vm1, %v1096_v2 }
 0x149   : > { %v1009_v15 = vpop.f32.mrf.mxu0 }
 0x14a   : > { %1124 = vst.msk [vmem:[#allocation2 + $0x18] sm:$0xff] %vm1120_vm1, %v1009_v15  ;;  %v1515_v15 = vld [vmem:[%s3391_s3 + $0x8] sm:$0xff] }
 0x14b   : > { %1588 = vmatpush.msrb.mxu2 %v1515_v15  ;;  %v1418_v15 = vand.u32 2147483647, %v3081_v51 }
 0x14d   : > { %vm3222_vm10 = vcmp.eq.f32.partialorder %v1418_v15, 8.507059e+37 }
 0x14f   : > { %v1066_v20 = vpop.f32.mrf.mxu2 }
 0x150   : > { %1143 = vst.msk [vmem:[#allocation2 + $0xb0] sm:$0xff] %vm1120_vm1, %v1066_v20  ;;  %v1099_v62 = vpop.f32.mrf.mxu3  ;;  %v1485_v20 = vmul.f32 %v3077_v55, %v3061_v25 }
 0x151   : > { %v1012_v14 = vpop.f32.mrf.mxu0  ;;  %1154 = vst.msk [vmem:[#allocation2 + $0x108] sm:$0xff] %vm1120_vm1, %v1099_v62  ;;  %v1042_v22 = vpop.f32.mrf.mxu1  ;;  %v1396_v62 = vsub.f32 1.0, %v1395_v40 }
 0x152   : > { %1125 = vst.msk [vmem:[#allocation2 + $0x20] sm:$0xff] %vm1120_vm1, %v1012_v14  ;;  %v1486_v19 = vsub.f32 1.0, %v1485_v20 }
 0x153   : > { %1135 = vst.msk [vmem:[#allocation2 + $0x70] sm:$0xff] %vm1120_vm1, %v1042_v22 }
 0x154   : > { %v1487_v38 = vmul.f32 %v3077_v55, %v1486_v19  ;;  %v1448_v19 = vand.u32 2147483647, %v3084_v56 }
 0x156   : > { %v1488_v10 = vadd.f32 %v3077_v55, %v1487_v38  ;;  %vm3237_vm12 = vcmp.eq.f32.partialorder %v1448_v19, 8.507059e+37 }
 0x158   : > { %v1069_v18 = vpop.f32.mrf.mxu2 }
 0x159   : > { %v1102_v59 = vpop.f32.mrf.mxu3  ;;  %v1015_v63 = vpop.f32.mrf.mxu0  ;;  %1144 = vst.msk [vmem:[#allocation2 + $0xb8] sm:$0xff] %vm1120_vm1, %v1069_v18  ;;  %v1161_v58 = vld [vmem:[#allocation2] ss:$5 sm:$0xff]  ;;  %v1177_v34 = vld [vmem:[#allocation2 + $0x1] ss:$5 sm:$0xff] }
 0x15a   : > { %v1045_v37 = vpop.f32.mrf.mxu1  ;;  %1155 = vst.msk [vmem:[#allocation2 + $0x110] sm:$0xff] %vm1120_vm1, %v1102_v59  ;;  %v1192_v0 = vmax.f32 %v1161_v58, %v1177_v34  ;;  %v1201_v3 = vld [vmem:[#allocation2 + $0x2] ss:$5 sm:$0xff]  ;;  %v1225_v26 = vld [vmem:[#allocation2 + $0x3] ss:$5 sm:$0xff]  ;;  %v3108_v18 = vpop.eup %1856  ;;  %v1397_v59 = vmul.f32 %v3073_v49, %v1396_v62 }
 0x15b   : > { %1126 = vst.msk [vmem:[#allocation2 + $0x28] sm:$0xff] %vm1120_vm1, %v1015_v63  ;;  %v1249_v32 = vld [vmem:[#allocation2 + $0x4] ss:$5 sm:$0xff]  ;;  %v3116_v63 = vpop.eup %1858  ;;  %v1410_v54 = vmul.f32 %v3108_v18, %v3081_v51  ;;  %vm1415_vm3 = vweird.f32 %v3108_v18 }
 0x15c   : > { %1136 = vst.msk [vmem:[#allocation2 + $0x78] sm:$0xff] %vm1120_vm1, %v1045_v37  ;;  %v1216_v17 = vmax.f32 %v1192_v0, %v1201_v3  ;;  %v1398_v23 = vadd.f32 %v3073_v49, %v1397_v59  ;;  %v1440_v58 = vmul.f32 %v3116_v63, %v3084_v56  ;;  %v1493_v3 = vand.u32 2147483647, %v3061_v25  ;;  %vm3189_vm6 = vmor %vm1414_vm2, %vm1415_vm3 }
 0x15d   : > { %v1411_v27 = vsub.f32 1.0, %v1410_v54  ;;  %vm1445_vm5 = vweird.f32 %v3116_v63 }
 0x15e   : > { %v1240_v5 = vmax.f32 %v1216_v17, %v1225_v26  ;;  %v3143_v17 = vrot.slane %v3058_v16, 4  ;;  %vm1494_vm0 = vcmp.eq.f32.partialorder %v1493_v3, 8.507059e+37  ;;  %vm3207_vm9 = vmor %vm1444_vm4, %vm1445_vm5 }
 0x160   : > { %v1264_v50 = vmax.f32 %v1240_v5, %v1249_v32  ;;  %v1441_v5 = vsub.f32 1.0, %v1440_v58  ;;  %1862 = vrcp.f32 %v3143_v17 }
 0x161   : > { %v1072_v52 = vpop.f32.mrf.mxu2  ;;  %v1018_v21 = vpop.f32.mrf.mxu0  ;;  %v1173_v48 = vld [vmem:[#allocation2 + $0xf0] ss:$5 sm:$0xff]  ;;  %v1189_v36 = vld [vmem:[#allocation2 + $0xf1] ss:$5 sm:$0xff]  ;;  %1864 = vrcp.f32 %v3160_v30 }
 0x162   : > { %1145 = vst.msk [vmem:[#allocation2 + $0xc0] sm:$0xff] %vm1120_vm1, %v1072_v52  ;;  %v1198_v8 = vmax.f32 %v1173_v48, %v1189_v36  ;;  %v1213_v29 = vld [vmem:[#allocation2 + $0xf2] ss:$5 sm:$0xff]  ;;  %v1237_v11 = vld [vmem:[#allocation2 + $0xf3] ss:$5 sm:$0xff]  ;;  %v1272_v2 = vsel %vm1120_vm1, %v1264_v50, 0.0  ;;  %v3139_v48 = vpop.eup %1860 }
 0x163   : > { %1127 = vst.msk [vmem:[#allocation2 + $0x30] sm:$0xff] %vm1120_vm1, %v1018_v21  ;;  %v1048_v9 = vpop.f32.mrf.mxu1  ;;  %v1261_v35 = vld [vmem:[#allocation2 + $0xf4] ss:$5 sm:$0xff]  ;;  %v1273_v12 = vrot.slane %v1272_v2, 4  ;;  %v1403_v52 = vand.u32 2147483647, %v3058_v16  ;;  %v1425_v26 = vmul.f32 %v3139_v48, %v3112_v41  ;;  %vm1430_vm8 = vweird.f32 %v3139_v48 }
 0x164   : > { %1137 = vst.msk [vmem:[#allocation2 + $0x80] sm:$0xff] %vm1120_vm1, %v1048_v9  ;;  %v1222_v39 = vmax.f32 %v1198_v8, %v1213_v29  ;;  %v1495_v9 = vand.u32 2147483648, %v3061_v25  ;;  %v1402_v8 = vsel %vm3131_vm13, %v3073_v49, %v1398_v23  ;;  %v1412_v29 = vmul.f32 %v3108_v18, %v1411_v27  ;;  %vm3230_vm11 = vmor %vm1429_vm7, %vm1430_vm8 }
 0x165   : > { %v1274_v6 = vadd.f32 %v1273_v12, %v1272_v2  ;;  %vm1404_vm15 = vcmp.eq.f32.partialorder %v1403_v52, 8.507059e+37  ;;  %vm1459_vm13 = vweird.f32 %v3143_v17  ;;  %vm1531_vm8 = vcmask 1041409  }
 0x166   : > { %v1246_v33 = vmax.f32 %v1222_v39, %v1237_v11  ;;  %v1496_v25 = vor.u32 1.1754944e-38, %v1495_v9  ;;  %v1492_v39 = vsel %vm3149_vm14, %v3077_v55, %v1488_v10  ;;  %v1413_v28 = vadd.f32 %v3108_v18, %v1412_v29  ;;  %v3181_v2 = vpop.eup %1862 }
 0x167   : > { %v1275_v46 = vrot.slane %v1274_v6, 2  ;;  %v3216_v52 = vpop.eup %1864 }
 0x168   : > { %v1270_v1 = vmax.f32 %v1246_v33, %v1261_v35  ;;  %v1420_v33 = vand.u32 2147483648, %v3081_v51  ;;  %v3175_v55 = vsel %vm1494_vm0, %v1496_v25, %v1492_v39  ;;  %v1417_v23 = vsel %vm3189_vm6, %v3108_v18, %v1413_v28 }
 0x169   : > { %v1276_v36 = vadd.f32 %v1275_v46, %v1274_v6  ;;  %v1465_v25 = vand.u32 2147483648, %v3143_v17  ;;  %vm1474_vm0 = vweird.f32 %v3160_v30  ;;  %vm1475_vm2 = vweird.f32 %v3216_v52 }
 0x16a   : > { %v1105_v24 = vpop.f32.mrf.mxu3  ;;  %v1021_v47 = vpop.f32.mrf.mxu0  ;;  %v1314_v31 = vsel %vm1120_vm1, %v1270_v1, 0.0  ;;  %vm3309_vm7 = vmor %vm1474_vm0, %vm1475_vm2  ;;  %vm1546_vm0 = vcmask 1046534   ;;  %vm1549_vm2 = vcmask 1047559  }
 0x16b   : > { %1156 = vst.msk [vmem:[#allocation2 + $0x118] sm:$0xff] %vm1120_vm1, %v1105_v24  ;;  %v1315_v37 = vrot.slane %v1314_v31, 4  ;;  %v1406_v24 = vor.u32 1.1754944e-38, %v1405_v57  ;;  %v1277_v49 = vrot.slane %v1276_v36, 1  ;;  %v1421_v57 = vor.u32 1.1754944e-38, %v1420_v33 }
 0x16c   : > { %1128 = vst.msk [vmem:[#allocation2 + $0x38] sm:$0xff] %vm1120_vm1, %v1021_v47  ;;  %v1463_v33 = vand.u32 2147483647, %v3143_v17  ;;  %v3270_v12 = vor.u32 1.1754944e-38, %v1465_v25 }
 0x16d   : > { %v1316_v45 = vadd.f32 %v1315_v37, %v1314_v31  ;;  %v3168_v50 = vsel %vm1404_vm15, %v1406_v24, %v1402_v8  ;;  %v3183_v20 = vadd.f32 %v1277_v49, %v1276_v36  ;;  %v1433_v8 = vand.u32 2147483647, %v3112_v41 }
 0x16e   : > { %vm1460_vm15 = vweird.f32 %v3181_v2  ;;  %vm3290_vm5 = vcmp.eq.f32.partialorder %v1463_v33, 8.507059e+37 }
 0x16f   : > { %v1317_v61 = vrot.slane %v1316_v45, 2  ;;  %vm3264_vm14 = vcmp.eq.f32.partialorder %v1433_v8, 8.507059e+37  ;;  %vm3300_vm6 = vmor %vm1459_vm13, %vm1460_vm15  ;;  %vm1537_vm13 = vcmask 1043459   ;;  %vm1543_vm15 = vcmask 1045509  }
 0x171   : > { %v1318_v11 = vadd.f32 %v1317_v61, %v1316_v45  ;;  %v1435_v45 = vand.u32 2147483648, %v3112_v41 }
 0x172   : > { %v1075_v44 = vpop.f32.mrf.mxu2  ;;  %v1108_v7 = vpop.f32.mrf.mxu3 }
 0x173   : > { %1146 = vst.msk [vmem:[#allocation2 + $0xc8] sm:$0xff] %vm1120_vm1, %v1075_v44  ;;  %v1051_v43 = vpop.f32.mrf.mxu1  ;;  %v1426_v44 = vsub.f32 1.0, %v1425_v26  ;;  %v1319_v46 = vrot.slane %v1318_v11, 1  ;;  %v1436_v49 = vor.u32 1.1754944e-38, %v1435_v45 }
 0x174   : > { %1157 = vst.msk [vmem:[#allocation2 + $0x120] sm:$0xff] %vm1120_vm1, %v1108_v7  ;;  %v1442_v7 = vmul.f32 %v3116_v63, %v1441_v5 }
 0x175   : > { %1138 = vst.msk [vmem:[#allocation2 + $0x88] sm:$0xff] %vm1120_vm1, %v1051_v43  ;;  %v1427_v62 = vmul.f32 %v3139_v48, %v1426_v44  ;;  %v3244_v61 = vadd.f32 %v1319_v46, %v1318_v11 }
 0x176   : > { %v1443_v31 = vadd.f32 %v3116_v63, %v1442_v7 }
 0x178   : > { %v1447_v3 = vsel %vm3207_vm9, %v3116_v63, %v1443_v31  ;;  %v1470_v63 = vmul.f32 %v3216_v52, %v3160_v30 }
 0x17a   : > { %v1078_v14 = vpop.f32.mrf.mxu2 }
 0x17b   : > { %1147 = vst.msk [vmem:[#allocation2 + $0xd0] sm:$0xff] %vm1120_vm1, %v1078_v14  ;;  %v1024_v22 = vpop.f32.mrf.mxu0  ;;  %v1111_v60 = vpop.f32.mrf.mxu3  ;;  %v1450_v14 = vand.u32 2147483648, %v3084_v56 }
 0x17c   : > { %1129 = vst.msk [vmem:[#allocation2 + $0x40] sm:$0xff] %vm1120_vm1, %v1024_v22  ;;  %v1054_v42 = vpop.f32.mrf.mxu1 }
 0x17d   : > { %1158 = vst.msk [vmem:[#allocation2 + $0x128] sm:$0xff] %vm1120_vm1, %v1111_v60  ;;  %v1451_v4 = vor.u32 1.1754944e-38, %v1450_v14 }
 0x17e   : > { %1139 = vst.msk [vmem:[#allocation2 + $0x90] sm:$0xff] %vm1120_vm1, %v1054_v42  ;;  %v3197_v42 = vrot.slane %v3058_v16, 7  ;;  %v1455_v16 = vmul.f32 %v3181_v2, %v3143_v17 }
 0x17f   : > { %v3258_v44 = vsel %vm3237_vm12, %v1451_v4, %v1447_v3  ;;  %vm1534_vm12 = vcmask 1042434  }
 0x180   : > { %v1456_v26 = vsub.f32 1.0, %v1455_v16  ;;  %1866 = vrcp.f32 %v3197_v42  ;;  %vm1504_vm3 = vweird.f32 %v3197_v42 }
 0x182   : > { %v1081_v34 = vpop.f32.mrf.mxu2 }
 0x183   : > { %v1027_v21 = vpop.f32.mrf.mxu0  ;;  %1148 = vst.msk [vmem:[#allocation2 + $0xd8] sm:$0xff] %vm1120_vm1, %v1081_v34 }
 0x184   : > { %v1057_v0 = vpop.f32.mrf.mxu1  ;;  %1130 = vst.msk [vmem:[#allocation2 + $0x48] sm:$0xff] %vm1120_vm1, %v1027_v21  ;;  %v1428_v21 = vadd.f32 %v3139_v48, %v1427_v62  ;;  %v1471_v62 = vsub.f32 1.0, %v1470_v63 }
 0x185   : > { %1140 = vst.msk [vmem:[#allocation2 + $0x98] sm:$0xff] %vm1120_vm1, %v1057_v0 }
 0x186   : > { %v1432_v41 = vsel %vm3230_vm11, %v3139_v48, %v1428_v21  ;;  %v1457_v48 = vmul.f32 %v3181_v2, %v1456_v26  ;;  %v3272_v14 = vpop.eup %1866  ;;  %v1478_v21 = vand.u32 2147483647, %v3160_v30 }
 0x187   : > { %v3277_v46 = vsel %vm3264_vm14, %v1436_v49, %v1432_v41  ;;  %v1500_v18 = vmul.f32 %v3272_v14, %v3197_v42  ;;  %vm1505_vm4 = vweird.f32 %v3272_v14  ;;  %vm1540_vm14 = vcmask 1044484  }
 0x188   : > { %v1114_v32 = vpop.f32.mrf.mxu3  ;;  %vm3329_vm9 = vmor %vm1504_vm3, %vm1505_vm4 }
 0x189   : > { %1159 = vst.msk [vmem:[#allocation2 + $0x130] sm:$0xff] %vm1120_vm1, %v1114_v32  ;;  %v3251_v32 = vsel %vm3222_vm10, %v1421_v57, %v1417_v23  ;;  %vm3335_vm10 = vcmp.eq.f32.partialorder %v1478_v21, 8.507059e+37 }
 0x18b   : > { %v1030_v43 = vpop.f32.mrf.mxu0  ;;  %v1163_v40 = vld [vmem:[#allocation2 + $0x28] ss:$5 sm:$0xff]  ;;  %v1179_v13 = vld [vmem:[#allocation2 + $0x29] ss:$5 sm:$0xff] }
 0x18c   : > { %v1193_v53 = vmax.f32 %v1163_v40, %v1179_v13  ;;  %v1167_v35 = vld [vmem:[#allocation2 + $0x78] ss:$5 sm:$0xff]  ;;  %v1183_v1 = vld [vmem:[#allocation2 + $0x79] ss:$5 sm:$0xff]  ;;  %1131 = vst.msk [vmem:[#allocation2 + $0x50] sm:$0xff] %vm1120_vm1, %v1030_v43 }
 0x18d   : > { %v1203_v22 = vld [vmem:[#allocation2 + $0x2a] ss:$5 sm:$0xff]  ;;  %v1195_v60 = vmax.f32 %v1167_v35, %v1183_v1  ;;  %v1207_v6 = vld [vmem:[#allocation2 + $0x7a] ss:$5 sm:$0xff] }
 0x18e   : > { %v1217_v51 = vmax.f32 %v1193_v53, %v1203_v22  ;;  %v1227_v37 = vld [vmem:[#allocation2 + $0x2b] ss:$5 sm:$0xff]  ;;  %v1231_v56 = vld [vmem:[#allocation2 + $0x7b] ss:$5 sm:$0xff] }
 0x18f   : > { %v1219_v38 = vmax.f32 %v1195_v60, %v1207_v6  ;;  %v1251_v27 = vld [vmem:[#allocation2 + $0x2c] ss:$5 sm:$0xff]  ;;  %v1255_v24 = vld [vmem:[#allocation2 + $0x7c] ss:$5 sm:$0xff] }
 0x190   : > { %v1060_v54 = vpop.f32.mrf.mxu1  ;;  %v1117_v58 = vpop.f32.mrf.mxu3  ;;  %v1241_v34 = vmax.f32 %v1217_v51, %v1227_v37 }
 0x191   : > { %1141 = vst.msk [vmem:[#allocation2 + $0xa0] sm:$0xff] %vm1120_vm1, %v1060_v54  ;;  %v1084_v9 = vpop.f32.mrf.mxu2  ;;  %v1243_v0 = vmax.f32 %v1219_v38, %v1231_v56 }
 0x192   : > { %1160 = vst.msk [vmem:[#allocation2 + $0x138] sm:$0xff] %vm1120_vm1, %v1117_v58  ;;  %v1265_v47 = vmax.f32 %v1241_v34, %v1251_v27  ;;  %v3281_v34 = vadd.f32 %v3181_v2, %v1457_v48  ;;  %v1472_v27 = vmul.f32 %v3216_v52, %v1471_v62 }
 0x193   : > { %1149 = vst.msk [vmem:[#allocation2 + $0xe0] sm:$0xff] %vm1120_vm1, %v1084_v9  ;;  %v1267_v5 = vmax.f32 %v1243_v0, %v1255_v24  ;;  %v1165_v29 = vld [vmem:[#allocation2 + $0x50] ss:$5 sm:$0xff]  ;;  %v1181_v39 = vld [vmem:[#allocation2 + $0x51] ss:$5 sm:$0xff] }
 0x194   : > { %v1194_v7 = vmax.f32 %v1165_v29, %v1181_v39  ;;  %v1279_v43 = vsel %vm1120_vm1, %v1265_v47, 0.0  ;;  %v1205_v40 = vld [vmem:[#allocation2 + $0x52] ss:$5 sm:$0xff]  ;;  %v1229_v19 = vld [vmem:[#allocation2 + $0x53] ss:$5 sm:$0xff] }
 0x195   : > { %v1293_v11 = vsel %vm1120_vm1, %v1267_v5, 0.0  ;;  %v1280_v13 = vrot.slane %v1279_v43, 4  ;;  %v1253_v56 = vld [vmem:[#allocation2 + $0x54] ss:$5 sm:$0xff] }
 0x196   : > { %v1294_v28 = vrot.slane %v1293_v11, 4  ;;  %v1218_v1 = vmax.f32 %v1194_v7, %v1205_v40 }
 0x197   : > { %v1281_v51 = vadd.f32 %v1280_v13, %v1279_v43  ;;  %v1473_v13 = vadd.f32 %v3216_v52, %v1472_v27 }
 0x198   : > { %v1169_v53 = vld [vmem:[#allocation2 + $0xa0] ss:$5 sm:$0xff]  ;;  %v1185_v35 = vld [vmem:[#allocation2 + $0xa1] ss:$5 sm:$0xff]  ;;  %v1295_v6 = vadd.f32 %v1294_v28, %v1293_v11  ;;  %v1242_v38 = vmax.f32 %v1218_v1, %v1229_v19  ;;  %v1501_v28 = vsub.f32 1.0, %v1500_v18 }
 0x199   : > { %v1175_v22 = vld [vmem:[#allocation2 + $0x118] ss:$5 sm:$0xff]  ;;  %v1191_v60 = vld [vmem:[#allocation2 + $0x119] ss:$5 sm:$0xff]  ;;  %v1196_v31 = vmax.f32 %v1169_v53, %v1185_v35  ;;  %v1282_v24 = vrot.slane %v1281_v51, 2 }
 0x19a   : > { %v1171_v59 = vld [vmem:[#allocation2 + $0xc8] ss:$5 sm:$0xff]  ;;  %v1187_v16 = vld [vmem:[#allocation2 + $0xc9] ss:$5 sm:$0xff]  ;;  %v1199_v37 = vmax.f32 %v1175_v22, %v1191_v60  ;;  %v1266_v0 = vmax.f32 %v1242_v38, %v1253_v56  ;;  %v1239_v3 = vld [vmem:[#allocation2 + $0x11b] ss:$5 sm:$0xff] }
 0x19b   : > { %v1209_v54 = vld [vmem:[#allocation2 + $0xa2] ss:$5 sm:$0xff]  ;;  %v1197_v23 = vmax.f32 %v1171_v59, %v1187_v16  ;;  %v1215_v57 = vld [vmem:[#allocation2 + $0x11a] ss:$5 sm:$0xff]  ;;  %v1211_v45 = vld [vmem:[#allocation2 + $0xca] ss:$5 sm:$0xff]  ;;  %v1283_v41 = vadd.f32 %v1282_v24, %v1281_v51 }
 0x19c   : > { %v1220_v58 = vmax.f32 %v1196_v31, %v1209_v54  ;;  %v1223_v4 = vmax.f32 %v1199_v37, %v1215_v57  ;;  %v1233_v9 = vld [vmem:[#allocation2 + $0xa3] ss:$5 sm:$0xff]  ;;  %v1296_v47 = vrot.slane %v1295_v6, 2  ;;  %v1235_v8 = vld [vmem:[#allocation2 + $0xcb] ss:$5 sm:$0xff]  ;;  %v1286_v25 = vsel %vm1120_vm1, %v1266_v0, 0.0 }
 0x19d   : > { %v1221_v10 = vmax.f32 %v1197_v23, %v1211_v45  ;;  %v1257_v5 = vld [vmem:[#allocation2 + $0xa4] ss:$5 sm:$0xff]  ;;  %v1263_v29 = vld [vmem:[#allocation2 + $0x11c] ss:$5 sm:$0xff]  ;;  %v1287_v49 = vrot.slane %v1286_v25, 4  ;;  %v1284_v48 = vrot.slane %v1283_v41, 1  ;;  %v1502_v31 = vmul.f32 %v3272_v14, %v1501_v28 }
 0x19e   : > { %v1244_v36 = vmax.f32 %v1220_v58, %v1233_v9  ;;  %v1247_v26 = vmax.f32 %v1223_v4, %v1239_v3  ;;  %v1259_v7 = vld [vmem:[#allocation2 + $0xcc] ss:$5 sm:$0xff]  ;;  %v1297_v11 = vadd.f32 %v1296_v47, %v1295_v6  ;;  %v1462_v37 = vsel %vm3300_vm6, %v3181_v2, %v3281_v34 }
 0x19f   : > { %v1245_v63 = vmax.f32 %v1221_v10, %v1235_v8  ;;  %v1288_v53 = vadd.f32 %v1287_v49, %v1286_v25  ;;  %v1285_v19 = vadd.f32 %v1284_v48, %v1283_v41  ;;  %v1480_v54 = vand.u32 2147483648, %v3160_v30 }
 0x1a0   : > { %v1268_v39 = vmax.f32 %v1244_v36, %v1257_v5  ;;  %v1271_v43 = vmax.f32 %v1247_v26, %v1263_v29  ;;  %v1298_v33 = vrot.slane %v1297_v11, 1  ;;  %v1477_v57 = vsel %vm3309_vm7, %v3216_v52, %v1473_v13 }
 0x1a1   : > { %v1269_v15 = vmax.f32 %v1245_v63, %v1259_v7  ;;  %v1289_v17 = vrot.slane %v1288_v53, 2  ;;  %v1503_v58 = vadd.f32 %v3272_v14, %v1502_v31  ;;  %v1423_v4 = vmul.f32 %v3251_v32, %v1285_v19 }
 0x1a2   : > { %v1300_v35 = vsel %vm1120_vm1, %v1268_v39, 0.0  ;;  %v1321_v22 = vsel %vm1120_vm1, %v1271_v43, 0.0  ;;  %v1508_v30 = vand.u32 2147483647, %v3197_v42  ;;  %v1299_v9 = vadd.f32 %v1298_v33, %v1297_v11 }
 0x1a3   : > { %v1301_v62 = vrot.slane %v1300_v35, 4  ;;  %v1307_v51 = vsel %vm1120_vm1, %v1269_v15, 0.0  ;;  %v1322_v6 = vrot.slane %v1321_v22, 4  ;;  %v1290_v38 = vadd.f32 %v1289_v17, %v1288_v53 }
 0x1a4   : > { %v1308_v16 = vrot.slane %v1307_v51, 4  ;;  %v1510_v52 = vand.u32 2147483648, %v3197_v42  ;;  %v1481_v32 = vor.u32 1.1754944e-38, %v1480_v54  ;;  %v1507_v24 = vsel %vm3329_vm9, %v3272_v14, %v1503_v58 }
 0x1a5   : > { %v1302_v59 = vadd.f32 %v1301_v62, %v1300_v35  ;;  %v1323_v23 = vadd.f32 %v1322_v6, %v1321_v22  ;;  %v1291_v34 = vrot.slane %v1290_v38, 1  ;;  %vm1509_vm11 = vcmp.eq.f32.partialorder %v1508_v30, 8.507059e+37 }
 0x1a6   : > { %v1309_v45 = vadd.f32 %v1308_v16, %v1307_v51  ;;  %v1511_v47 = vor.u32 1.1754944e-38, %v1510_v52  ;;  %v1530_v5 = vrot.slane %v1423_v4, 7  ;;  %v1453_v21 = vmul.f32 %v3258_v44, %v1299_v9 }
 0x1a7   : > { %v1303_v56 = vrot.slane %v1302_v59, 2  ;;  %v1324_v0 = vrot.slane %v1323_v23, 2  ;;  %v1292_v3 = vadd.f32 %v1291_v34, %v1290_v38  ;;  %v1467_v63 = vsel %vm3290_vm5, %v3270_v12, %v1462_v37 }
 0x1a8   : > { %v1310_v18 = vrot.slane %v1309_v45, 2  ;;  %v1408_v41 = vmul.f32 %v3168_v50, %v3183_v20  ;;  %v1482_v49 = vsel %vm3335_vm10, %v1481_v32, %v1477_v57  ;;  %v1512_v7 = vsel %vm1509_vm11, %v1511_v47, %v1507_v24 }
 0x1a9   : > { %v1304_v27 = vadd.f32 %v1303_v56, %v1302_v59  ;;  %v1325_v36 = vadd.f32 %v1324_v0, %v1323_v23  ;;  %v1438_v42 = vmul.f32 %v3277_v46, %v1292_v3  ;;  %v1498_v12 = vmul.f32 %v3175_v55, %v3244_v61 }
 0x1aa   : > { %v1311_v26 = vadd.f32 %v1310_v18, %v1309_v45  ;;  %v1532_v44 = vsel %vm1531_vm8, %v1530_v5, %v1408_v41  ;;  %v1536_v13 = vrot.slane %v1453_v21, 5 }
 0x1ab   : > { %v1305_v8 = vrot.slane %v1304_v27, 1  ;;  %v1326_v25 = vrot.slane %v1325_v36, 1  ;;  %v1533_v43 = vrot.slane %v1438_v42, 6  ;;  %v1545_v35 = vrot.slane %v1498_v12, 2 }
 0x1ac   : > { %v1312_v39 = vrot.slane %v1311_v26, 1 }
 0x1ad   : > { %v1306_v29 = vadd.f32 %v1305_v8, %v1304_v27  ;;  %v1327_v14 = vadd.f32 %v1326_v25, %v1325_v36  ;;  %v1535_v40 = vsel %vm1534_vm12, %v1533_v43, %v1532_v44 }
 0x1ae   : > { %v1313_v11 = vadd.f32 %v1312_v39, %v1311_v26  ;;  %v1538_v15 = vsel %vm1537_vm13, %v1536_v13, %v1535_v40 }
 0x1af   : > { %v1468_v46 = vmul.f32 %v1467_v63, %v1306_v29  ;;  %v1513_v50 = vmul.f32 %v1512_v7, %v1327_v14 }
 0x1b0   : > { %v1483_v28 = vmul.f32 %v1482_v49, %v1313_v11 }
 0x1b1   : > { %v1539_v20 = vrot.slane %v1468_v46, 4  ;;  %v1548_v33 = vrot.slane %v1513_v50, 1 }
 0x1b2   : > { %v1542_v53 = vrot.slane %v1483_v28, 3 }
 0x1b3   : > { %v1541_v48 = vsel %vm1540_vm14, %v1539_v20, %v1538_v15 }
 0x1b4   : > { %v1544_v1 = vsel %vm1543_vm15, %v1542_v53, %v1541_v48 }
 0x1b5   : > { %v1547_v62 = vsel %vm1546_vm0, %v1545_v35, %v1544_v1 }
 0x1b6   : > { %v1550_v22 = vsel %vm1549_vm2, %v1548_v33, %v1547_v62 }
 0x1b7   : > { %1718 = vmatmul.msk.f32.vlgmr.msrb.gmra.mxu1 %vm1120_vm1, %v1550_v22  ;;  %1719 = vmatmul.msk.f32.vlgmr.msrb.gmra.mxu2 %vm1120_vm1, %v1550_v22 }
 0x234   : > { %v1570_v55 = vpop.f32.mrf.mxu1 }
 0x235   : > { %1593 = vst [vmem:[%s173_s5] sm:$0xff] %v1570_v55 }
 0x23a   : > { %v1590_v61 = vpop.f32.mrf.mxu2 }
 0x23b   : > { %1594 = vst [vmem:[%s173_s5 + $0x8] sm:$0xff] %v1590_v61 }
 0x23c   : > { %1923 = shalt.err (!%p1920_p3)
}
 0x23d   : > { %1732 = dma.vmem_to_hbm [thread:$0]  (%p2029_p5), %s1610_s6, 256, %s1612_s7, %s1596_s8  }
 0x23e PF: > { %p1738_p4 = scmp.ge.s32.totalorder %s1960_s22, 2  ;;  %s1623_s16 = sand.u32 1, %s1948_s19  }
 0x23f   : > { %s1624_s17 = scalar_lea.sflag [#allocation6], %s1623_s16 }
 0x240   : > { %p1735_p7 = pnand %p1738_p4, %p2033_p6 }
 0x242   : > { %p1736_p8 = pneg %p1735_p7 }
 0x244   : > { %1943 = dma.done.wait (%p1736_p8), %s1624_s17, 256  }
 0x245   : > { %1945 = vsyncadd (%p1736_p8), %s1624_s17, 4294967040  ;;  %p22_p9 = scmp.ge.s32.totalorder %s2016_s24, 4   ;;  %s3461_s19 = smov %s1952_s20 }
 0x246   : > { %s3462_s20 = smov %s1956_s21  ;;  %s3463_s21 = smov %s2027_s27 }
 0x247   : > { %s3464_s22 = smov %s2016_s24  ;;  %24 = sbr.rel (!%p22_p9) target bundleno = 9 (0x9), region = 106 }
 0x24c   :  { %1630 = vsyncpa [#allocation6], 1 }
 0x24d   :  { %1632 = vsyncpa [#allocation6 + $0x1], 1 }

</bundles_post_ra>
